<compile_context>
chip_gen: v5e
topology: v5e:2x2
jax: 0.10.0
libtpu: 0.0.40
codegen_flags: <defaults>
</compile_context>

<pallas_src>
import math
from functools import partial

import jax
import jax.numpy as jnp
from jax import lax
from jax.experimental import pallas as pl
from jax.experimental.pallas import tpu as pltpu


# ---------------------------------------------------------------------------
# Fused kernel: one block of `bblk` batch elements per grid step.
# ---------------------------------------------------------------------------
def _iqn_fused_kernel(obs_ref, samples_ref,
                      hw_ref, hb_ref, cw_ref, cb_ref,
                      w1_ref, b1_ref, w2_ref, b2_ref,
                      o_ref, *, bblk, T, N, n_cos, mxu_dtype):
    """Refs (per grid step, all VMEM-resident):
      obs_ref     (bblk*T, D)        observations, row = b_local*T + t
      samples_ref (bblk*T*N, 1)      tau samples, row j -> (t, n) = (j//N, j%N)
      head / cos / fc1 weights       (D,L),(1,L) / (n_cos,L),(1,L) / (L,L),(1,L)
      w2_ref, b2_ref                 fc2 weight as (1, L) row and (1, 1) bias
      o_ref       (1, 1, bblk*T*N)   quantiles, lane-dense
    """
    L = hw_ref.shape[1]
    TN = T * N
    rows = bblk * TN

    # --- head: x = relu(obs @ Wh + bh) for the whole batch block   (bblk*T, L)
    x = jnp.maximum(
        jnp.dot(obs_ref[...], hw_ref[...], preferred_element_type=jnp.float32)
        + hb_ref[...], 0.0)

    # --- cosine embedding                                          (rows, L)
    # The module's `pis` buffer has identical rows (pi * (1..n_cos)); build the
    # single row in-register from an iota instead of DMA-ing a (T*N, n_cos)
    # table.  samples*pis and cos() stay f32 (argument reaches ~pi*n_cos rad).
    pis_row = (lax.broadcasted_iota(jnp.int32, (1, n_cos), 1)
               .astype(jnp.float32) + 1.0) * math.pi                 # (1, n_cos)
    cos_vals = jnp.cos(samples_ref[...] * pis_row)                   # (rows, n_cos)
    cx = jnp.maximum(
        jnp.dot(cos_vals.astype(mxu_dtype), cw_ref[...],
                preferred_element_type=jnp.float32) + cb_ref[...], 0.0)

    # --- PyTorch .view quirk: within each batch element, cos row j pairs with
    # head row (j % T) -> broadcast x over the N axis (no concat, no gather).
    # T=8 is sublane-aligned so these f32 reshapes are layout-preserving.
    z = (cx.reshape(bblk, N, T, L) * x.reshape(bblk, 1, T, L)).reshape(rows, L)

    # --- fc1 + relu                                                (rows, L)
    h = jnp.maximum(
        jnp.dot(z.astype(mxu_dtype), w1_ref[...],
                preferred_element_type=jnp.float32) + b1_ref[...], 0.0)

    # --- fc2 (L -> 1), kept f32.  Contracting h's feature dim against the fc2
    # weight row (w2 @ h^T) yields the result directly as a lane-dense
    # (1, rows) vector: wide unmasked store, no (rows,1)->(1,rows) relayout.
    o = lax.dot_general(w2_ref[...], h, (((1,), (1,)), ((), ())),
                        preferred_element_type=jnp.float32)          # (1, rows)
    o_ref[0] = o + b2_ref[...]


# ---------------------------------------------------------------------------
# Forward wrapper (noisy=False path; plain nn.Linear layers)
# ---------------------------------------------------------------------------
def _pick_batch_block(B, TN, target_rows=256):
    """Largest divisor of B giving ~target MXU rows while keeping >=2 steps."""
    bblk = min(B, max(1, -(-target_rows // TN)))      # cdiv(target_rows, TN)
    if B >= 2:
        bblk = min(bblk, B // 2)                      # >=2 steps: balance 2 TCs (v7x)
    bblk = max(bblk, 1)
    while B % bblk:
        bblk -= 1
    return bblk


@partial(jax.jit, static_argnames=("N", "n_cos", "b_blk", "use_bf16_mxu"))
def iqn_forward(obs, samples, params, N, n_cos, b_blk=None, use_bf16_mxu=False):
    """Fused IQN forward.  obs (B,T,D), samples (B,T,N,1) ~ U[0,1).
    Returns (quantiles (B,T,N,1), samples), like IQNModule.forward."""
    B, T, D = obs.shape
    L = params["head_w"].shape[1]
    TN = T * N

    bblk = _pick_batch_block(B, TN) if b_blk is None else b_blk
    if B % bblk:
        raise ValueError(f"b_blk={bblk} must divide batch size {B}")
    nblk = B // bblk
    rows = bblk * TN

    mxu_dtype = jnp.bfloat16 if use_bf16_mxu else jnp.float32
    mxu_bytes = 2 if use_bf16_mxu else 4

    # 2-D views whose row order matches the kernel's internal j index; MXU
    # operand casts happen in the wrapper so the DMAs also shrink to bf16.
    obs_2d = obs.reshape(B * T, D).astype(mxu_dtype)
    samples_2d = samples.reshape(B * TN, 1)            # f32: cos() phase accuracy
    hw = params["head_w"].astype(mxu_dtype)
    cw = params["cos_w"].astype(mxu_dtype)
    w1 = params["fc1_w"].astype(mxu_dtype)
    w2_row = params["fc2_w"].reshape(1, L)             # (L,1) -> (1,L), f32

    def const_spec(shape):                             # VMEM-resident across grid
        return pl.BlockSpec(shape, lambda i: (0,) * len(shape))

    cost = pl.CostEstimate(
        flops=2 * B * (T * D * L + TN * n_cos * L + TN * L * L + TN * L),
        transcendentals=B * TN * n_cos,
        bytes_accessed=(B * T * D * mxu_bytes + B * TN * 4
                        + (D * L + n_cos * L + L * L) * mxu_bytes
                        + (4 * L + 1) * 4 + B * TN * 4))

    out = pl.pallas_call(
        partial(_iqn_fused_kernel, bblk=bblk, T=T, N=N, n_cos=n_cos,
                mxu_dtype=mxu_dtype),
        grid=(nblk,),
        in_specs=[
            pl.BlockSpec((bblk * T, D), lambda i: (i, 0)),    # obs rows
            pl.BlockSpec((rows, 1), lambda i: (i, 0)),        # tau samples
            const_spec((D, L)), const_spec((1, L)),           # head
            const_spec((n_cos, L)), const_spec((1, L)),       # cos_embedding
            const_spec((L, L)), const_spec((1, L)),           # fc1
            const_spec((1, L)), const_spec((1, 1)),           # fc2 (row + bias)
        ],
        # Lane-dense output: one (1, rows) row per grid step.
        out_specs=pl.BlockSpec((1, 1, rows), lambda i: (i, 0, 0)),
        out_shape=jax.ShapeDtypeStruct((nblk, 1, rows), jnp.float32),
        compiler_params=pltpu.CompilerParams(
            dimension_semantics=("parallel",),
            # Sized with v7x (64 MiB physical / 32 MiB default scoped) in mind;
            # resident weights + double-buffered blocks are far below this.
            # (pl.Buffered(1) on the constant specs would halve their VMEM
            #  footprint; left at the default here since the weights are tiny.)
            vmem_limit_bytes=32 * 1024 * 1024),
        cost_estimate=cost,
    )(obs_2d, samples_2d, hw, params["head_b"], cw, params["cos_b"],
      w1, params["fc1_b"], w2_row, params["fc2_b"])

    # Block row j of batch b -> (t, n) = (j // N, j % N); identical to torch's
    # final .view(batch, episode_length, N, 1) on the (batch*N, T, 1) tensor.
    return out.reshape(B, T, N, 1), samples


# ---------------------------------------------------------------------------
# Deterministic parameter init (matches nn.Linear fan-in uniform bounds)
# ---------------------------------------------------------------------------
def init_params(key, input_dim, episode_length, N, layer_size, n_cos):
    ks = jax.random.split(key, 8)

    def lin(kw, kb, fan_in, fan_out):
        bound = 1.0 / math.sqrt(fan_in)
        w = jax.random.uniform(kw, (fan_in, fan_out), jnp.float32, -bound, bound)
        b = jax.random.uniform(kb, (1, fan_out), jnp.float32, -bound, bound)
        return w, b

    head_w, head_b = lin(ks[0], ks[1], input_dim, layer_size)
    cos_w, cos_b = lin(ks[2], ks[3], n_cos, layer_size)
    fc1_w, fc1_b = lin(ks[4], ks[5], layer_size, layer_size)
    fc2_w, fc2_b = lin(ks[6], ks[7], layer_size, 1)

    pis = jnp.asarray(
        [[math.pi * i for i in range(1, n_cos + 1)]
         for _ in range(episode_length)],
        jnp.float32).reshape(1, episode_length, n_cos)   # module buffer (ref only)

    # TODO(synk): noisy=True (LinearNoise) path with per-forward Gaussian
    # weight/bias noise is not implemented; module default is noisy=False.
    return dict(head_w=head_w, head_b=head_b, cos_w=cos_w, cos_b=cos_b,
                fc1_w=fc1_w, fc1_b=fc1_b, fc2_w=fc2_w, fc2_b=fc2_b, pis=pis)


# ---------------------------------------------------------------------------
# Pure-JAX reference mirroring the PyTorch forward (incl. .view quirks)
# ---------------------------------------------------------------------------
def ref_forward(obs, samples, p, N, n_cos):
    B, T, _ = obs.shape
    L = p["head_w"].shape[1]
    x = jax.nn.relu(obs @ p["head_w"] + p["head_b"])                  # (B,T,L)
    cos_values = jnp.cos(samples * p["pis"][:, :, None, :])           # (B,T,N,C)
    cos_values = cos_values.reshape(B * N, T, n_cos)                  # .view
    cos_x = jax.nn.relu(cos_values @ p["cos_w"] + p["cos_b"])
    cos_x = cos_x.reshape(B, N, T, L)                                 # .view
    z = (x[:, None, :, :] * cos_x).reshape(B * N, T, L)               # .view
    h = jax.nn.relu(z @ p["fc1_w"] + p["fc1_b"])
    o = h @ p["fc2_w"] + p["fc2_b"]
    return o.reshape(B, T, N, 1)                                      # .view


# ---------------------------------------------------------------------------
if __name__ == "__main__":
    B, T, D_in, N, L, n_cos = 4, 8, 16, 4, 32, 64    # batch, ep_len, input_dim...
    key = jax.random.PRNGKey(0)
    k_obs, k_smp, k_par = jax.random.split(key, 3)

    obs = jax.random.normal(k_obs, (B, T, D_in), jnp.float32)
    # stands in for torch.rand in get_cosine_values (tau samples ~ U[0,1))
    samples = jax.random.uniform(k_smp, (B, T, N, 1), jnp.float32)
    params = init_params(k_par, D_in, T, N, L, n_cos)

    expected = ref_forward(obs, samples, params, N, n_cos)

    # f32 MXU operands: tight check of the fused-kernel structure.
    out, smp = iqn_forward(obs, samples, params, N, n_cos)
    out = jax.block_until_ready(out)
    assert out.shape == (B, T, N, 1) and smp.shape == (B, T, N, 1)
    assert jnp.allclose(out, expected, atol=1e-4, rtol=1e-4), "f32 mismatch vs reference"

    # bf16 MXU operands (recommended on v6e/v7x): looser tolerance per review.
    out_bf16, _ = iqn_forward(obs, samples, params, N, n_cos, use_bf16_mxu=True)
    out_bf16 = jax.block_until_ready(out_bf16)
    assert jnp.allclose(out_bf16, expected, atol=3e-2, rtol=3e-2), "bf16 mismatch vs reference"

    print("KERNEL_OK")
</pallas_src>

<mosaic_0001>
module attributes {stable_mosaic.version = 11 : i64} {
  func.func @_iqn_fused_kernel(%arg0: i32, %arg1: memref<16x16xf32, #tpu.memory_space<vmem>>, %arg2: memref<64x1xf32, #tpu.memory_space<vmem>>, %arg3: memref<16x32xf32, #tpu.memory_space<vmem>>, %arg4: memref<1x32xf32, #tpu.memory_space<vmem>>, %arg5: memref<64x32xf32, #tpu.memory_space<vmem>>, %arg6: memref<1x32xf32, #tpu.memory_space<vmem>>, %arg7: memref<32x32xf32, #tpu.memory_space<vmem>>, %arg8: memref<1x32xf32, #tpu.memory_space<vmem>>, %arg9: memref<1x32xf32, #tpu.memory_space<vmem>>, %arg10: memref<1x1xf32, #tpu.memory_space<vmem>>, %arg11: memref<1x1x64xf32, #tpu.memory_space<vmem>>) attributes {dimension_semantics = [#tpu.dimension_semantics<parallel>], iteration_bounds = array<i64: 2>, scalar_prefetch = 0 : i64, scratch_operands = 0 : i64, tpu.core_type = #tpu.core_type<tc>, window_params = [{transform_indices = @transform_0, window_bounds = array<i64: 16, 16>}, {transform_indices = @transform_1, window_bounds = array<i64: 64, 1>}, {pipeline_mode = #tpu.pipeline_mode<synchronous>, transform_indices = @transform_2, window_bounds = array<i64: 16, 32>}, {pipeline_mode = #tpu.pipeline_mode<synchronous>, transform_indices = @transform_3, window_bounds = array<i64: 1, 32>}, {pipeline_mode = #tpu.pipeline_mode<synchronous>, transform_indices = @transform_4, window_bounds = array<i64: 64, 32>}, {pipeline_mode = #tpu.pipeline_mode<synchronous>, transform_indices = @transform_5, window_bounds = array<i64: 1, 32>}, {pipeline_mode = #tpu.pipeline_mode<synchronous>, transform_indices = @transform_6, window_bounds = array<i64: 32, 32>}, {pipeline_mode = #tpu.pipeline_mode<synchronous>, transform_indices = @transform_7, window_bounds = array<i64: 1, 32>}, {pipeline_mode = #tpu.pipeline_mode<synchronous>, transform_indices = @transform_8, window_bounds = array<i64: 1, 32>}, {pipeline_mode = #tpu.pipeline_mode<synchronous>, transform_indices = @transform_9, window_bounds = array<i64: 1, 1>}, {transform_indices = @transform_10, window_bounds = array<i64: 1, 1, 64>}]} {
    %c0 = arith.constant 0 : index
    %c0_0 = arith.constant 0 : index
    %0 = vector.load %arg1[%c0, %c0_0] : memref<16x16xf32, #tpu.memory_space<vmem>>, vector<16x16xf32>
    %c0_1 = arith.constant 0 : index
    %c0_2 = arith.constant 0 : index
    %1 = vector.load %arg3[%c0_1, %c0_2] : memref<16x32xf32, #tpu.memory_space<vmem>>, vector<16x32xf32>
    %cst = arith.constant dense<0.000000e+00> : vector<16x32xf32>
    %2 = tpu.matmul %0, %1, %cst {dimension_numbers = #tpu.dot_dimension_numbers<[1], [0], [0], [1], [0, 0, 1, 1], [], []>} : vector<16x16xf32>, vector<16x32xf32>, vector<16x32xf32> -> vector<16x32xf32>
    %c0_3 = arith.constant 0 : index
    %c0_4 = arith.constant 0 : index
    %3 = vector.load %arg4[%c0_3, %c0_4] : memref<1x32xf32, #tpu.memory_space<vmem>>, vector<1x32xf32>
    %4 = vector.broadcast %3 : vector<1x32xf32> to vector<16x32xf32>
    %5 = arith.addf %2, %4 : vector<16x32xf32>
    %cst_5 = arith.constant 0.000000e+00 : f32
    %6 = vector.broadcast %cst_5 : f32 to vector<16x32xf32>
    %7 = arith.maximumf %5, %6 : vector<16x32xf32>
    %8 = tpu.iota {dimensions = array<i32: 1>} : vector<1x64xi32>
    %9 = arith.sitofp %8 : vector<1x64xi32> to vector<1x64xf32>
    %cst_6 = arith.constant 1.000000e+00 : f32
    %10 = vector.broadcast %cst_6 : f32 to vector<1x64xf32>
    %11 = arith.addf %9, %10 : vector<1x64xf32>
    %cst_7 = arith.constant 3.14159274 : f32
    %12 = vector.broadcast %cst_7 : f32 to vector<1x64xf32>
    %13 = arith.mulf %11, %12 : vector<1x64xf32>
    %c0_8 = arith.constant 0 : index
    %c0_9 = arith.constant 0 : index
    %14 = vector.load %arg2[%c0_8, %c0_9] : memref<64x1xf32, #tpu.memory_space<vmem>>, vector<64x1xf32>
    %15 = vector.broadcast %14 : vector<64x1xf32> to vector<64x64xf32>
    %16 = vector.broadcast %13 : vector<1x64xf32> to vector<64x64xf32>
    %17 = arith.mulf %15, %16 : vector<64x64xf32>
    %18 = math.cos %17 : vector<64x64xf32>
    %c0_10 = arith.constant 0 : index
    %c0_11 = arith.constant 0 : index
    %19 = vector.load %arg5[%c0_10, %c0_11] : memref<64x32xf32, #tpu.memory_space<vmem>>, vector<64x32xf32>
    %cst_12 = arith.constant dense<0.000000e+00> : vector<64x32xf32>
    %20 = tpu.matmul %18, %19, %cst_12 {dimension_numbers = #tpu.dot_dimension_numbers<[1], [0], [0], [1], [0, 0, 1, 1], [], []>} : vector<64x64xf32>, vector<64x32xf32>, vector<64x32xf32> -> vector<64x32xf32>
    %c0_13 = arith.constant 0 : index
    %c0_14 = arith.constant 0 : index
    %21 = vector.load %arg6[%c0_13, %c0_14] : memref<1x32xf32, #tpu.memory_space<vmem>>, vector<1x32xf32>
    %22 = vector.broadcast %21 : vector<1x32xf32> to vector<64x32xf32>
    %23 = arith.addf %20, %22 : vector<64x32xf32>
    %cst_15 = arith.constant 0.000000e+00 : f32
    %24 = vector.broadcast %cst_15 : f32 to vector<64x32xf32>
    %25 = arith.maximumf %23, %24 : vector<64x32xf32>
    %26 = vector.shape_cast %25 : vector<64x32xf32> to vector<2x4x8x32xf32>
    %27 = vector.shape_cast %7 : vector<16x32xf32> to vector<2x1x8x32xf32>
    %28 = vector.broadcast %27 : vector<2x1x8x32xf32> to vector<2x4x8x32xf32>
    %29 = arith.mulf %26, %28 : vector<2x4x8x32xf32>
    %30 = vector.shape_cast %29 : vector<2x4x8x32xf32> to vector<64x32xf32>
    %c0_16 = arith.constant 0 : index
    %c0_17 = arith.constant 0 : index
    %31 = vector.load %arg7[%c0_16, %c0_17] : memref<32x32xf32, #tpu.memory_space<vmem>>, vector<32x32xf32>
    %cst_18 = arith.constant dense<0.000000e+00> : vector<64x32xf32>
    %32 = tpu.matmul %30, %31, %cst_18 {dimension_numbers = #tpu.dot_dimension_numbers<[1], [0], [0], [1], [0, 0, 1, 1], [], []>} : vector<64x32xf32>, vector<32x32xf32>, vector<64x32xf32> -> vector<64x32xf32>
    %c0_19 = arith.constant 0 : index
    %c0_20 = arith.constant 0 : index
    %33 = vector.load %arg8[%c0_19, %c0_20] : memref<1x32xf32, #tpu.memory_space<vmem>>, vector<1x32xf32>
    %34 = vector.broadcast %33 : vector<1x32xf32> to vector<64x32xf32>
    %35 = arith.addf %32, %34 : vector<64x32xf32>
    %cst_21 = arith.constant 0.000000e+00 : f32
    %36 = vector.broadcast %cst_21 : f32 to vector<64x32xf32>
    %37 = arith.maximumf %35, %36 : vector<64x32xf32>
    %c0_22 = arith.constant 0 : index
    %c0_23 = arith.constant 0 : index
    %38 = vector.load %arg9[%c0_22, %c0_23] : memref<1x32xf32, #tpu.memory_space<vmem>>, vector<1x32xf32>
    %cst_24 = arith.constant dense<0.000000e+00> : vector<1x64xf32>
    %39 = tpu.matmul %38, %37, %cst_24 {dimension_numbers = #tpu.dot_dimension_numbers<[1], [1], [0], [0], [0, 0, 1, 0], [], []>} : vector<1x32xf32>, vector<64x32xf32>, vector<1x64xf32> -> vector<1x64xf32>
    %c0_25 = arith.constant 0 : index
    %c0_26 = arith.constant 0 : index
    %40 = vector.load %arg10[%c0_25, %c0_26] : memref<1x1xf32, #tpu.memory_space<vmem>>, vector<1x1xf32>
    %41 = vector.broadcast %40 : vector<1x1xf32> to vector<1x64xf32>
    %42 = arith.addf %39, %41 : vector<1x64xf32>
    %c0_27 = arith.constant 0 : index
    %c0_28 = arith.constant 0 : index
    %c0_29 = arith.constant 0 : index
    %43 = vector.load %arg11[%c0_27, %c0_28, %c0_29] : memref<1x1x64xf32, #tpu.memory_space<vmem>>, vector<1x1x64xf32>
    %44 = vector.shape_cast %43 : vector<1x1x64xf32> to vector<1x64xf32>
    %45 = vector.shape_cast %42 : vector<1x64xf32> to vector<1x1x64xf32>
    tpu.vector_store %arg11[%c0_27, %c0_28, %c0_29], %45 {strides = array<i32>} : memref<1x1x64xf32, #tpu.memory_space<vmem>>, vector<1x1x64xf32>,
    return
  }
  func.func @transform_0(%arg0: i32) -> (i32, i32) {
    %c0_i32 = arith.constant 0 : i32
    %c0_i32_0 = arith.constant 0 : i32
    return %arg0, %c0_i32 : i32, i32
  }
  func.func @transform_1(%arg0: i32) -> (i32, i32) {
    %c0_i32 = arith.constant 0 : i32
    %c0_i32_0 = arith.constant 0 : i32
    return %arg0, %c0_i32 : i32, i32
  }
  func.func @transform_2(%arg0: i32) -> (i32, i32) {
    %c0_i32 = arith.constant 0 : i32
    %c0_i32_0 = arith.constant 0 : i32
    %c0_i32_1 = arith.constant 0 : i32
    return %c0_i32, %c0_i32_0 : i32, i32
  }
  func.func @transform_3(%arg0: i32) -> (i32, i32) {
    %c0_i32 = arith.constant 0 : i32
    %c0_i32_0 = arith.constant 0 : i32
    %c0_i32_1 = arith.constant 0 : i32
    return %c0_i32, %c0_i32_0 : i32, i32
  }
  func.func @transform_4(%arg0: i32) -> (i32, i32) {
    %c0_i32 = arith.constant 0 : i32
    %c0_i32_0 = arith.constant 0 : i32
    %c0_i32_1 = arith.constant 0 : i32
    return %c0_i32, %c0_i32_0 : i32, i32
  }
  func.func @transform_5(%arg0: i32) -> (i32, i32) {
    %c0_i32 = arith.constant 0 : i32
    %c0_i32_0 = arith.constant 0 : i32
    %c0_i32_1 = arith.constant 0 : i32
    return %c0_i32, %c0_i32_0 : i32, i32
  }
  func.func @transform_6(%arg0: i32) -> (i32, i32) {
    %c0_i32 = arith.constant 0 : i32
    %c0_i32_0 = arith.constant 0 : i32
    %c0_i32_1 = arith.constant 0 : i32
    return %c0_i32, %c0_i32_0 : i32, i32
  }
  func.func @transform_7(%arg0: i32) -> (i32, i32) {
    %c0_i32 = arith.constant 0 : i32
    %c0_i32_0 = arith.constant 0 : i32
    %c0_i32_1 = arith.constant 0 : i32
    return %c0_i32, %c0_i32_0 : i32, i32
  }
  func.func @transform_8(%arg0: i32) -> (i32, i32) {
    %c0_i32 = arith.constant 0 : i32
    %c0_i32_0 = arith.constant 0 : i32
    %c0_i32_1 = arith.constant 0 : i32
    return %c0_i32, %c0_i32_0 : i32, i32
  }
  func.func @transform_9(%arg0: i32) -> (i32, i32) {
    %c0_i32 = arith.constant 0 : i32
    %c0_i32_0 = arith.constant 0 : i32
    %c0_i32_1 = arith.constant 0 : i32
    return %c0_i32, %c0_i32_0 : i32, i32
  }
  func.func @transform_10(%arg0: i32) -> (i32, i32, i32) {
    %c0_i32 = arith.constant 0 : i32
    %c0_i32_0 = arith.constant 0 : i32
    %c0_i32_1 = arith.constant 0 : i32
    return %arg0, %c0_i32, %c0_i32_0 : i32, i32, i32
  }
}

</mosaic_0001>

<bundles_post_ra>
// kernel: iqn_forward.1
= control target key start
LH: loop header
LB: loop body
LE: loop exit
PB: predicated region body
PF: predicated region fallthrough
CT: control target
= control target key end

     0   :  { %s2171_s15 = smov 0   ;;  %s3436_s0 = inlined_call_operand.vmem [shape: f32[32,16], index: 0, kind: input, shape index: {}]   ;;  %s3437_s1 = inlined_call_operand.vmem [shape: f32[128,1], index: 1, kind: input, shape index: {}]   ;;  %s3438_s2 = inlined_call_operand.vmem [shape: f32[16,32], index: 2, kind: input, shape index: {}]   ;;  %s3439_s3 = inlined_call_operand.vmem [shape: f32[1,32], index: 3, kind: input, shape index: {}]   ;;  %s3440_s4 = inlined_call_operand.vmem [shape: f32[64,32], index: 4, kind: input, shape index: {}]   ;;  %s3441_s5 = inlined_call_operand.vmem [shape: f32[1,32], index: 5, kind: input, shape index: {}]   ;;  %s3442_s6 = inlined_call_operand.vmem [shape: f32[32,32], index: 6, kind: input, shape index: {}]   ;;  %s3443_s7 = inlined_call_operand.vmem [shape: f32[1,32], index: 7, kind: input, shape index: {}]   ;;  %s3444_s8 = inlined_call_operand.vmem [shape: f32[1,32], index: 8, kind: input, shape index: {}]   ;;  %s3445_s9 = inlined_call_operand.<no memory space> [shape: f32[1,1], index: 9, kind: input, shape index: {}]   ;;  %s3446_s10 = inlined_call_operand.vmem [shape: f32[2,1,64], index: 10, kind: output, shape index: {}]  }
   0x1   :  { %v15_v0 = vstv %s3445_s9 }
   0x2   :  { %16 = vst [vmem:[#allocation2] sm:$0x1] %v15_v0 }
   0x3 LB: > { %s2177_s16 = sadd.s32 4294967295, %s2104_s15   ;;  %p2011_p0 = scmp.ge.s32.totalorder %s2104_s15, 1  ;;  %s2104_s15 = sphi %s2171_s15, %s22_s15  }
   0x4   : > { %p326_p1 = scmp.lt.s32.totalorder %s2104_s15, 3 }
   0x6   : > { %p327_p2 = pnand %p2011_p0, %p326_p1 }
   0x8   : > { %330 = sbr.rel (%p327_p2) target bundleno = 908 (0x38c), region = 60 }
   0xd   : > { %s2014_s17 = sshll.u32 %s2177_s16, 3  ;;  %v3454_v1 = vmov 0   ;;  %v1892_v9 = vld [vmem:[#allocation2] sm:$0x1]  ;;  %v422_v11 = vlaneseq  ;;  %v3462_v29 = vmov 920167782  }
   0xe   : > { %2094 = vset.pattern.permute.xlu2 %v3454_v1  ;;  %2093 = vset.pattern.permute.xlu1 %v3454_v1  ;;  %p374_p3 = scmp.lt.s32.totalorder %s2014_s17, 15  ;;  %v3460_v32 = vmov 1326507024   ;;  %s2012_s21 = sshll.u32 %s2177_s16, 1  ;;  %vm390_vm12 = vcmask 130048  }
   0xf   : > { %2092 = vset.pattern.permute.xlu0 %v3454_v1  ;;  %v423_v12 = vand.u32 127, %v422_v11  ;;  %p2300_p4 = scmp.lt.s32.totalorder %s2012_s21, 3  ;;  %p379_p5 = scmp.lt.s32.totalorder %s2177_s16, 1 }
  0x10   : > { %s3557_s17 = smov (!%p374_p3, %s2014_s17), 15 }
  0x11   : > { %s2015_s9 = sshll.u32 %s3557_s17, 3  ;;  %v424_v13 = vcvt.s32.f32 %v423_v12  ;;  %s3559_s21 = smov (!%p2300_p4, %s2012_s21), 3 }
  0x12   : > { %s377_s20 = scalar_lea.vmem %s3437_s1, %s2015_s9  ;;  %s2013_s17 = sshll.u32 %s3559_s21, 3 }
  0x13   : > { %v431_v2 = vld [vmem:[%s377_s20 + $0x20] sm:$0xff]  ;;  %v429_v3 = vld [vmem:[%s377_s20 + $0x10] sm:$0xff]  ;;  %v432_v5 = vld [vmem:[%s377_s20 + $0x28] sm:$0xff]  ;;  %v425_v14 = vadd.f32 1.0, %v424_v13  ;;  %s2391_s21 = scalar_lea.vmem %s3436_s0, %s2013_s17  ;;  %s3561_s16 = smov (!%p379_p5, %s2177_s16), 1 }
  0x14   : > { %v427_v4 = vld [vmem:[%s377_s20] sm:$0xff]  ;;  %457 = vperm.xlu2 %2094, %v431_v2   ;;  %447 = vperm.xlu1 %2093, %v429_v3   ;;  %v430_v6 = vld [vmem:[%s377_s20 + $0x18] sm:$0xff]  ;;  %v428_v7 = vld [vmem:[%s377_s20 + $0x8] sm:$0xff]  ;;  %s381_s27 = scalar_lea.vmem %s3446_s10, %s3561_s16 }
  0x15   : > { %437 = vperm.xlu0 %2092, %v427_v4   ;;  %v434_v8 = vld [vmem:[%s377_s20 + $0x38] sm:$0xff]  ;;  %v433_v10 = vld [vmem:[%s377_s20 + $0x30] sm:$0xff]  ;;  %v2188_v15 = vmul.f32 3.1415927, %v425_v14  ;;  %v3448_v14 = vmov 2131351028  }
  0x1c   : > { %462 = vperm.xlu2 %2094, %v432_v5   ;;  %452 = vperm.xlu1 %2093, %v430_v6  }
  0x1d   : > { %442 = vperm.xlu0 %2092, %v428_v7  }
  0x24   : > { %472 = vperm.xlu1 %2093, %v434_v8   ;;  %1895 = vperm.xlu2 %2094, %v1892_v9   ;;  %v383_v8 = vld [vmem:[%s2391_s21 + $0x8] sm:$0xff] }
  0x25   : > { %467 = vperm.xlu0 %2092, %v433_v10   ;;  %v3450_v10 = vmov 2475754826  }
  0x6e   : > { %v458_v16 = vpop.permute.xlu2 %457 }
  0x6f   : > { %v2191_v17 = vmul.f32 %v458_v16, %v2188_v15 }
  0x71   : > { %v1102_v18 = vand.u32 2139095040, %v2191_v17 }
  0x73   : > { %v1103_v19 = vshrl.u32 %v1102_v18, 23 }
  0x75   : > { %v2030_v20 = vadd.s32 4294967169, %v1103_v19  ;;  %v3458_v19 = vmov 2102212464  }
  0x76   : > { %v463_v21 = vpop.permute.xlu2 %462 }
  0x77   : > { %v1109_v22 = vadd.s32 1, %v2030_v20  ;;  %v2195_v23 = vmul.f32 %v463_v21, %v2188_v15 }
  0x79   : > { %3486 = vst [vmem:[#allocation3_spill] sm:$0xff] %v2195_v23  ;;  %vm1110_vm0 = vcmp.gt.s32.totalorder %v1109_v22, 0  ;;  %v1256_v24 = vand.u32 2139095040, %v2195_v23 }
  0x7a   : > { %v2198_v25 = vsel %vm1110_vm0, %v1109_v22, 0 }
  0x7b   : > { %v2201_v26 = vand.u32 31, %v2198_v25  ;;  %v1257_v27 = vshrl.u32 %v1256_v24, 23 }
  0x7d   : > { %v2204_v28 = vsub.s32 32, %v2201_v26  ;;  %v2208_v30 = vshll.u32 %v3462_v29, %v2201_v26  ;;  %v2033_v31 = vadd.s32 4294967169, %v1257_v27 }
  0x7f   : > { %v2212_v33 = vshrl.u32 %v3460_v32, %v2204_v28  ;;  %v1263_v34 = vadd.s32 1, %v2033_v31  ;;  %v3452_v31 = vmov 683565275  }
  0x81   : > { %v1130_v35 = vor.u32 %v2212_v33, %v2208_v30  ;;  %vm1264_vm1 = vcmp.gt.s32.totalorder %v1263_v34, 0  ;;  %v1716_v33 = vld [vmem:[%s3440_s4 + $0x8] sm:$0xff] }
  0x82   : > { %v2216_v36 = vsel %vm1264_vm1, %v1263_v34, 0 }
  0x83   : > { %v2219_v37 = vand.u32 31, %v2216_v36 }
  0x85   : > { %3487 = vst [vmem:[#allocation4_spill] sm:$0xff] %v2219_v37  ;;  %v2222_v38 = vsub.s32 32, %v2219_v37  ;;  %v2226_v39 = vshll.u32 %v3462_v29, %v2219_v37 }
  0x86   : > { %v448_v40 = vpop.permute.xlu1 %447 }
  0x87   : > { %3488 = vst [vmem:[#allocation5_spill] sm:$0xff] %v2222_v38  ;;  %v2229_v41 = vmul.f32 %v448_v40, %v2188_v15  ;;  %v438_v42 = vpop.permute.xlu0 %437  ;;  %v2233_v43 = vshrl.u32 %v3460_v32, %v2222_v38 }
  0x88   : > { %v2236_v44 = vmul.f32 %v438_v42, %v2188_v15 }
  0x89   : > { %v794_v45 = vand.u32 2139095040, %v2229_v41 }
  0x8a   : > { %v486_v48 = vand.u32 2139095040, %v2236_v44  ;;  %v3447_v54 = vand.u32 2147483647, %v2236_v44 }
  0x8b   : > { %v795_v47 = vshrl.u32 %v794_v45, 23 }
  0x8c   : > { %v487_v50 = vshrl.u32 %v486_v48, 23  ;;  %v490_v60 = vand.u32 8388607, %v3447_v54 }
  0x8d   : > { %v2024_v49 = vadd.s32 4294967169, %v795_v47 }
  0x8e   : > { %v2018_v52 = vadd.s32 4294967169, %v487_v50  ;;  %v453_v56 = vpop.permute.xlu1 %452  ;;  %v491_v5 = vor.u32 8388608, %v490_v60  ;;  %v385_v50 = vld [vmem:[%s3438_s2 + $0x8] sm:$0xff] }
  0x8f   : > { %v801_v51 = vadd.s32 1, %v2024_v49  ;;  %v443_v53 = vpop.permute.xlu0 %442  ;;  %v2254_v62 = vmul.f32 %v453_v56, %v2188_v15  ;;  %411 = vmatpush.msra.mxu0 %v385_v50  ;;  %v1722_v56 = vld [vmem:[%s3440_s4 + $0x38] sm:$0xff] }
  0x90   : > { %v493_v55 = vadd.s32 1, %v2018_v52  ;;  %v2244_v57 = vmul.f32 %v443_v53, %v2188_v15  ;;  %2069 = vmatpush.msra.mxu1 %v1722_v56 }
  0x91   : > { %vm802_vm2 = vcmp.gt.s32.totalorder %v801_v51, 0  ;;  %v948_v7 = vand.u32 2139095040, %v2254_v62 }
  0x92   : > { %v2246_v58 = vsel %vm802_vm2, %v801_v51, 0  ;;  %vm494_vm3 = vcmp.gt.s32.totalorder %v493_v55, 0  ;;  %v640_v2 = vand.u32 2139095040, %v2244_v57  ;;  %v384_v51 = vld [vmem:[%s3438_s2] sm:$0xff] }
  0x93   : > { %v2249_v59 = vand.u32 31, %v2246_v58  ;;  %v495_v61 = vsel %vm494_vm3, %v493_v55, 0  ;;  %v949_v48 = vshrl.u32 %v948_v7, 23  ;;  %v2307_v55 = vshll.u32 %v491_v5, 8  ;;  %412 = vmatpush.msra.mxu0 %v384_v51  ;;  %v1719_v51 = vld [vmem:[%s3440_s4 + $0x20] sm:$0xff] }
  0x94   : > { %v497_v3 = vand.u32 31, %v495_v61  ;;  %v2273_v9 = vshrl.u32 %v495_v61, 5  ;;  %v641_v12 = vshrl.u32 %v640_v2, 23 }
  0x95   : > { %v2257_v63 = vsub.s32 32, %v2249_v59  ;;  %v2261_v0 = vshll.u32 %v3462_v29, %v2249_v59  ;;  %1760 = vmatpush.msrb.mxu0 %v1722_v56 }
  0x96   : > { %v2268_v6 = vsub.s32 32, %v497_v3  ;;  %v503_v11 = vshll.u32 %v3450_v10, %v497_v3  ;;  %v506_v18 = vshll.u32 %v3448_v14, %v497_v3  ;;  %v509_v21 = vshll.u32 %v3458_v19, %v497_v3  ;;  %v473_v49 = vpop.permute.xlu1 %472 }
  0x97   : > { %v2266_v4 = vshrl.u32 %v3460_v32, %v2257_v63  ;;  %v512_v24 = vshll.u32 %v3462_v29, %v497_v3  ;;  %v500_v34 = vshll.u32 %v3452_v31, %v497_v3  ;;  %vm515_vm4 = vcmp.lt.s32.totalorder %v2273_v9, 1 }
  0x98   : > { %v501_v13 = vshrl.u32 %v3450_v10, %v2268_v6  ;;  %v504_v16 = vshrl.u32 %v3448_v14, %v2268_v6  ;;  %v507_v20 = vshrl.u32 %v3458_v19, %v2268_v6  ;;  %v510_v22 = vshrl.u32 %v3462_v29, %v2268_v6 }
  0x99   : > { %v513_v27 = vshrl.u32 %v3460_v32, %v2268_v6  ;;  %vm518_vm5 = vcmp.lt.s32.totalorder %v2273_v9, 4  ;;  %vm517_vm6 = vcmp.lt.s32.totalorder %v2273_v9, 3  ;;  %v2021_v2 = vadd.s32 4294967169, %v641_v12 }
  0x9a   : > { %v505_v40 = vor.u32 %v504_v16, %v503_v11  ;;  %v508_v42 = vor.u32 %v507_v20, %v506_v18  ;;  %v511_v45 = vor.u32 %v510_v22, %v509_v21  ;;  %v502_v52 = vor.u32 %v501_v13, %v500_v34  ;;  %v1721_v11 = vld [vmem:[%s3440_s4 + $0x30] sm:$0xff]  ;;  %v468_v18 = vpop.permute.xlu0 %467 }
  0x9b   : > { %v514_v47 = vor.u32 %v513_v27, %v512_v24  ;;  %v2318_v3 = vshrl.u32 %v2198_v25, 5  ;;  %vm516_vm7 = vcmp.lt.s32.totalorder %v2273_v9, 2  ;;  %v2324_v7 = vmul.f32 %v473_v49, %v2188_v15  ;;  %2070 = vmatpush.msra.mxu1 %v1721_v11  ;;  %v1720_v27 = vld [vmem:[%s3440_s4 + $0x28] sm:$0xff]  ;;  %1761 = vmatpush.msrb.mxu0 %v1721_v11 }
  0x9c   : > { %v527_v53 = vsel %vm515_vm4, %v505_v40, %v508_v42  ;;  %v524_v60 = vsel %vm518_vm5, %v511_v45, 920167782  ;;  %v1125_v12 = vshll.u32 %v3458_v19, %v2201_v26  ;;  %v1126_v25 = vshrl.u32 %v3462_v29, %v2204_v28 }
  0x9d   : > { %v528_v61 = vsel %vm518_vm5, %v514_v47, 1326507024  ;;  %3490 = vst [vmem:[#allocation6_spill] sm:$0xff] %v2324_v7  ;;  %v2027_v16 = vadd.s32 4294967169, %v949_v48  ;;  %v523_v20 = vsel %vm515_vm4, %v502_v52, %v505_v40  ;;  %v525_v21 = vsel %vm517_vm6, %v508_v42, %v524_v60  ;;  %2071 = vmatpush.msra.mxu1 %v1720_v27  ;;  %1762 = vmatpush.msrb.mxu0 %v1720_v27 }
  0x9e   : > { %v529_v5 = vsel %vm517_vm6, %v511_v45, %v528_v61  ;;  %v2348_v22 = vand.u32 65535, %v2307_v55  ;;  %v520_v34 = vsel %vm518_vm5, %v508_v42, 2102212464  ;;  %v647_v45 = vadd.s32 1, %v2021_v2  ;;  %v1718_v61 = vld [vmem:[%s3440_s4 + $0x18] sm:$0xff] }
  0x9f   : > { %v2335_v13 = vsel %vm516_vm7, %v527_v53, %v529_v5  ;;  %v1564_v49 = vand.u32 2139095040, %v2324_v7  ;;  %v2362_v50 = vmul.f32 %v468_v18, %v2188_v15  ;;  %v2367_v53 = vor.u32 %v1126_v25, %v1125_v12  ;;  %2072 = vmatpush.msra.mxu1 %v1719_v51  ;;  %1763 = vmatpush.msrb.mxu0 %v1719_v51  ;;  %v382_v51 = vld [vmem:[%s2391_s21] sm:$0xff] }
  0xa0   : > { %v535_v24 = vshrl.u32 %v2335_v13, 16  ;;  %v534_v47 = vand.u32 65535, %v2335_v13  ;;  %v499_v42 = vshrl.u32 %v3452_v31, %v2268_v6  ;;  %v2373_v56 = vsel %vm516_vm7, %v523_v20, %v525_v21  ;;  %2016 = vmatmul.msk.f32.vlgmr.msra.gmra.mxu0 %vm390_vm12, %v382_v51 }
  0xa1   : > { %3491 = vst [vmem:[#allocation7_spill] sm:$0xff] %v2362_v50  ;;  %v955_v60 = vadd.s32 1, %v2027_v16  ;;  %vm1134_vm8 = vcmp.lt.s32.totalorder %v2318_v3, 4  ;;  %v521_v6 = vsel %vm517_vm6, %v505_v40, %v520_v34  ;;  %vm648_vm9 = vcmp.gt.s32.totalorder %v647_v45, 0  ;;  %2073 = vmatpush.msra.mxu1 %v1718_v61  ;;  %1764 = vmatpush.msrb.mxu0 %v1718_v61 }
  0xa2   : > { %v2358_v48 = vmul.u32 %v535_v24, %v2348_v22  ;;  %3492 = vst [vmem:[#allocation8_spill] sm:$0xff] %v2367_v53  ;;  %v519_v2 = vsel %vm515_vm4, %v499_v42, %v502_v52  ;;  %v536_v5 = vmul.u32 %v534_v47, %v2348_v22  ;;  %v557_v11 = vshrl.u32 %v2373_v56, 16  ;;  %v1717_v52 = vld [vmem:[%s3440_s4 + $0x10] sm:$0xff] }
  0xa3   : > { %v1565_v12 = vshrl.u32 %v1564_v49, 23  ;;  %v1410_v25 = vand.u32 2139095040, %v2362_v50  ;;  %v2399_v40 = vsel %vm1134_vm8, %v2367_v53, 920167782  ;;  %v2406_v13 = vsel %vm1134_vm8, %v1130_v35, 1326507024  ;;  %2074 = vmatpush.msra.mxu1 %v1717_v52  ;;  %1765 = vmatpush.msrb.mxu0 %v1717_v52 }
  0xa4   : > { %v540_v15 = vshll.u32 %v2358_v48, 16  ;;  %3493 = vst [vmem:[#allocation9_spill] sm:$0xff] %v2399_v40  ;;  %v533_v16 = vshrl.u32 %v2307_v55, 16  ;;  %vm956_vm10 = vcmp.gt.s32.totalorder %v955_v60, 0  ;;  %v1279_v18 = vshll.u32 %v3458_v19, %v2219_v37 }
  0xa5   : > { %3494 = vst [vmem:[#allocation10_spill] sm:$0xff] %v2406_v13  ;;  %v1280_v20 = vshrl.u32 %v3462_v29, %v2222_v38  ;;  %v649_v30 = vsel %vm648_vm9, %v647_v45, 0  ;;  %v2422_v35 = vshrl.u32 %v2216_v36, 5  ;;  %v2426_v27 = vsel %vm516_vm7, %v519_v2, %v521_v6  ;;  %v1715_v36 = vld [vmem:[%s3440_s4] sm:$0xff]  ;;  %2075 = vmatpush.msra.mxu1 %v1716_v33  ;;  %1766 = vmatpush.msrb.mxu0 %v1716_v33 }
  0xa6   : > { %vm2413_vm11 = vc.u32 %v536_v5, %v540_v15  ;;  %v2428_v34 = vmul.u32 %v534_v47, %v533_v16  ;;  %v556_v49 = vand.u32 65535, %v2373_v56  ;;  %v2433_v45 = vmul.u32 %v557_v11, %v2348_v22 }
  0xa7   : > { %v957_v42 = vsel %vm956_vm10, %v955_v60, 0  ;;  %v2039_v61 = vadd.s32 4294967169, %v1565_v12  ;;  %v1411_v46 = vshrl.u32 %v1410_v25, 23  ;;  %v545_v9 = vsel %vm2413_vm11, 1, %v3454_v1  ;;  %2076 = vmatpush.msra.mxu1 %v1715_v36  ;;  %1767 = vmatpush.msrb.mxu0 %v1715_v36 }
  0xa8   : > { %v546_v47 = vadd.s32 %v540_v15, %v536_v5  ;;  %v2441_v2 = vand.u32 31, %v649_v30  ;;  %v2443_v56 = vor.u32 %v1280_v20, %v1279_v18  ;;  %v539_v6 = vmul.u32 %v535_v24, %v533_v16  ;;  %2017 = vmatmul.msk.f32.gmra.mxu0 %vm390_vm12, %v383_v8 }
  0xa9   : > { %v1571_v60 = vadd.s32 1, %v2039_v61  ;;  %v2036_v12 = vadd.s32 4294967169, %v1411_v46  ;;  %v542_v25 = vshll.u32 %v2428_v34, 16  ;;  %v558_v52 = vmul.u32 %v556_v49, %v2348_v22 }
  0xaa   : > { %v547_v5 = vadd.s32 %v545_v9, %v539_v6  ;;  %v2451_v18 = vand.u32 31, %v957_v42  ;;  %v2454_v46 = vsub.s32 32, %v2441_v2  ;;  %v562_v22 = vshll.u32 %v2433_v45, 16 }
  0xab   : > { %vm1572_vm13 = vcmp.gt.s32.totalorder %v1571_v60, 0  ;;  %v1417_v24 = vadd.s32 1, %v2036_v12  ;;  %vm548_vm14 = vc.u32 %v546_v47, %v542_v25  ;;  %v560_v33 = vmul.u32 %v556_v49, %v533_v16 }
  0xac   : > { %v2456_v20 = vsel %vm1572_vm13, %v1571_v60, 0  ;;  %v549_v61 = vsel %vm548_vm14, 1, %v3454_v1  ;;  %v561_v36 = vmul.u32 %v557_v11, %v533_v16  ;;  %v2463_v9 = vshrl.u32 %v957_v42, 5 }
  0xad   : > { %3497 = vst [vmem:[#allocation11_spill] sm:$0xff] %v2456_v20  ;;  %v2460_v51 = vand.u32 31, %v2456_v20  ;;  %vm1418_vm15 = vcmp.gt.s32.totalorder %v1417_v24, 0  ;;  %v2465_v6 = vshrl.u32 %v649_v30, 5  ;;  %v2471_v60 = vsub.s32 32, %v2451_v18 }
  0xae   : > { %v2467_v12 = vsel %vm1418_vm15, %v1417_v24, 0  ;;  %v2475_v49 = vshll.u32 %v3458_v19, %v2451_v18  ;;  %v551_v25 = vadd.s32 %v549_v61, %v547_v5  ;;  %v667_v11 = vshrl.u32 %v3460_v32, %v2454_v46 }
  0xaf   : > { %3498 = vst [vmem:[#allocation12_spill] sm:$0xff] %v2460_v51  ;;  %v2478_v47 = vsub.s32 32, %v2460_v51  ;;  %v2483_v16 = vand.u32 31, %v2467_v12  ;;  %v541_v30 = vshrl.u32 %v2358_v48, 16  ;;  %vm566_vm0 = vc.u32 %v558_v52, %v562_v22 }
  0xb0   : > { %3499 = vst [vmem:[#allocation13_spill] sm:$0xff] %v2467_v12  ;;  %v2488_v42 = vshll.u32 %v3462_v29, %v2460_v51  ;;  %v567_v5 = vsel %vm566_vm0, 1, %v3454_v1  ;;  %v568_v61 = vadd.s32 %v562_v22, %v558_v52  ;;  %v664_v54 = vshrl.u32 %v3462_v29, %v2454_v46 }
  0xb1   : > { %3500 = vst [vmem:[#allocation14_spill] sm:$0xff] %v2478_v47  ;;  %v2492_v24 = vshrl.u32 %v3460_v32, %v2478_v47  ;;  %v666_v48 = vshll.u32 %v3462_v29, %v2441_v2  ;;  %v2501_v21 = vsub.s32 32, %v2483_v16  ;;  %v564_v14 = vshll.u32 %v560_v33, 16 }
  0xb2   : > { %3501 = vst [vmem:[#allocation15_spill] sm:$0xff] %v2483_v16  ;;  %v663_v10 = vshll.u32 %v3458_v19, %v2441_v2  ;;  %v552_v8 = vadd.s32 %v551_v25, %v541_v30  ;;  %v569_v15 = vadd.s32 %v567_v5, %v561_v36  ;;  %v2509_v52 = vshll.u32 %v3462_v29, %v2483_v16 }
  0xb3   : > { %3502 = vst [vmem:[#allocation16_spill] sm:$0xff] %v2488_v42  ;;  %v668_v1 = vor.u32 %v667_v11, %v666_v48  ;;  %v2513_v22 = vshrl.u32 %v3460_v32, %v2501_v21  ;;  %vm570_vm1 = vc.u32 %v568_v61, %v564_v14  ;;  %v972_v7 = vshrl.u32 %v3462_v29, %v2471_v60 }
  0xb4   : > { %3503 = vst [vmem:[#allocation17_spill] sm:$0xff] %v2492_v24  ;;  %vm672_vm2 = vcmp.lt.s32.totalorder %v2465_v6, 4  ;;  %v543_v19 = vshrl.u32 %v2428_v34, 16  ;;  %v3507_v31 = vmov 0   ;;  %v665_v36 = vor.u32 %v664_v54, %v663_v10 }
  0xb5   : > { %3504 = vst [vmem:[#allocation18_spill] sm:$0xff] %v2501_v21  ;;  %v571_v25 = vsel %vm570_vm1, 1, %v3507_v31  ;;  %v563_v30 = vshrl.u32 %v2433_v45, 16  ;;  %v3508_v32 = vand.u32 2147483647, %v2244_v57  ;;  %v565_v10 = vshrl.u32 %v560_v33, 16 }
  0xb6   : > { %3505 = vst [vmem:[#allocation19_spill] sm:$0xff] %v2509_v52  ;;  %v573_v5 = vadd.s32 %v571_v25, %v569_v15  ;;  %v2523_v48 = vadd.s32 %v552_v8, %v543_v19  ;;  %v3509_v29 = vmov 683565275   ;;  %v3510_v50 = vmov 2475754826  }
  0xb7   : > { %3506 = vst [vmem:[#allocation20_spill] sm:$0xff] %v2513_v22  ;;  %v644_v42 = vand.u32 8388607, %v3508_v32  ;;  %v654_v24 = vshll.u32 %v3509_v29, %v2441_v2  ;;  %v655_v34 = vshrl.u32 %v3510_v50, %v2454_v46  ;;  %v682_v54 = vsel %vm672_vm2, %v668_v1, 1326507024 }
  0xb8   : > { %v2533_v21 = vadd.s32 %v568_v61, %v564_v14  ;;  %v574_v11 = vadd.s32 %v573_v5, %v563_v30  ;;  %v657_v19 = vshll.u32 %v3510_v50, %v2441_v2  ;;  %v3511_v32 = vmov 2131351028  }
  0xb9   : > { %v645_v45 = vor.u32 8388608, %v644_v42  ;;  %v656_v15 = vor.u32 %v655_v34, %v654_v24  ;;  %v658_v8 = vshrl.u32 %v3511_v32, %v2454_v46  ;;  %v678_v25 = vsel %vm672_vm2, %v665_v36, 920167782 }
  0xba   : > { %v575_v52 = vadd.s32 %v574_v11, %v565_v10  ;;  %v660_v22 = vshll.u32 %v3511_v32, %v2441_v2  ;;  %v3512_v1 = vmov 2102212464   ;;  %vm578_vm3 = vc.u32 %v2523_v48, %v2533_v21 }
  0xbb   : > { %v661_v14 = vshrl.u32 %v3512_v1, %v2454_v46  ;;  %v659_v33 = vor.u32 %v658_v8, %v657_v19  ;;  %vm669_vm4 = vcmp.lt.s32.totalorder %v2465_v6, 1  ;;  %vm671_vm5 = vcmp.lt.s32.totalorder %v2465_v6, 3 }
  0xbc   : > { %v579_v42 = vadd.s32 1, %v575_v52  ;;  %v683_v61 = vsel %vm671_vm5, %v665_v36, %v682_v54  ;;  %v2551_v11 = vshll.u32 %v645_v45, 8  ;;  %v3513_v2 = vmov 920167782  }
  0xbd   : > { %v662_v24 = vor.u32 %v661_v14, %v660_v22  ;;  %v974_v30 = vshll.u32 %v3513_v2, %v2451_v18  ;;  %v3514_v5 = vmov 1326507024   ;;  %vm980_vm6 = vcmp.lt.s32.totalorder %v2463_v9, 4 }
  0xbe   : > { %v975_v34 = vshrl.u32 %v3514_v5, %v2471_v60  ;;  %v677_v10 = vsel %vm669_vm4, %v656_v15, %v659_v33  ;;  %v580_v19 = vsel %vm578_vm3, %v579_v42, %v575_v52  ;;  %vm670_vm7 = vcmp.lt.s32.totalorder %v2465_v6, 2 }
  0xbf   : > { %v679_v22 = vsel %vm671_vm5, %v662_v24, %v678_v25  ;;  %v681_v36 = vsel %vm669_vm4, %v659_v33, %v662_v24  ;;  %v2566_v54 = vor.u32 %v972_v7, %v2475_v49  ;;  %v3515_v45 = vmul.u32 %v2307_v55, %v2426_v27 }
  0xc0   : > { %v680_v14 = vsel %vm670_vm7, %v677_v10, %v679_v22  ;;  %v684_v52 = vsel %vm670_vm7, %v681_v36, %v683_v61  ;;  %v686_v42 = vand.u32 65535, %v2551_v11  ;;  %v687_v25 = vshrl.u32 %v2551_v11, 16 }
  0xc1   : > { %v581_v8 = vadd.s32 %v580_v19, %v3515_v45  ;;  %v688_v5 = vand.u32 65535, %v684_v52  ;;  %v689_v38 = vshrl.u32 %v684_v52, 16  ;;  %v2578_v37 = vshrl.u32 %v2246_v58, 5 }
  0xc2   : > { %v710_v49 = vand.u32 65535, %v680_v14  ;;  %v711_v23 = vshrl.u32 %v680_v14, 16  ;;  %v2582_v55 = vshll.u32 %v3512_v1, %v2249_v59  ;;  %v653_v27 = vshrl.u32 %v3509_v29, %v2454_v46 }
  0xc3   : > { %v582_v7 = vadd.s32 536870912, %v581_v8  ;;  %v691_v61 = vmul.u32 %v689_v38, %v686_v42  ;;  %v692_v10 = vmul.u32 %v688_v5, %v687_v25  ;;  %v976_v19 = vor.u32 %v975_v34, %v974_v30 }
  0xc4   : > { %v2589_v22 = vsel %vm980_vm6, %v2566_v54, 920167782  ;;  %v713_v36 = vmul.u32 %v711_v23, %v686_v42  ;;  %v673_v45 = vsel %vm669_vm4, %v653_v27, %v656_v15  ;;  %v674_v14 = vsel %vm672_vm2, %v662_v24, 2102212464 }
  0xc5   : > { %v2591_v58 = vshrl.u32 %v582_v7, 30  ;;  %v690_v52 = vmul.u32 %v688_v5, %v686_v42  ;;  %v694_v16 = vshll.u32 %v691_v61, 16  ;;  %v693_v47 = vmul.u32 %v689_v38, %v687_v25 }
  0xc6   : > { %v712_v30 = vmul.u32 %v710_v49, %v686_v42  ;;  %v716_v34 = vshll.u32 %v713_v36, 16  ;;  %v696_v12 = vshll.u32 %v692_v10, 16  ;;  %v714_v40 = vmul.u32 %v710_v49, %v687_v25 }
  0xc7   : > { %v584_v46 = vshll.u32 %v2591_v58, 30  ;;  %vm698_vm9 = vc.u32 %v690_v52, %v694_v16  ;;  %v700_v51 = vadd.s32 %v694_v16, %v690_v52  ;;  %v675_v20 = vsel %vm671_vm5, %v659_v33, %v674_v14 }
  0xc8   : > { %v699_v15 = vsel %vm698_vm9, 1, %v3507_v31  ;;  %v945_v27 = vand.u32 2147483647, %v2254_v62  ;;  %v695_v24 = vshrl.u32 %v691_v61, 16  ;;  %vm720_vm11 = vc.u32 %v712_v30, %v716_v34 }
  0xc9   : > { %v585_v7 = vsub.s32 %v581_v8, %v584_v46  ;;  %v701_v5 = vadd.s32 %v699_v15, %v693_v47  ;;  %vm702_vm10 = vc.u32 %v700_v51, %v696_v12  ;;  %v715_v53 = vmul.u32 %v711_v23, %v687_v25 }
  0xca   : > { %v703_v42 = vsel %vm702_vm10, 1, %v3507_v31  ;;  %v718_v16 = vshll.u32 %v714_v40, 16  ;;  %v721_v8 = vsel %vm720_vm11, 1, %v3507_v31  ;;  %v722_v49 = vadd.s32 %v716_v34, %v712_v30 }
  0xcb   : > { %vm586_vm12 = vcmp.lt.s32.totalorder %v585_v7, 0  ;;  %v587_v38 = vsub.s32 0, %v585_v7  ;;  %v705_v13 = vadd.s32 %v703_v42, %v701_v5  ;;  %v990_v33 = vsel %vm980_vm6, %v976_v19, 1326507024 }
  0xcc   : > { %v577_v14 = vadd.s32 %v2533_v21, %v2523_v48  ;;  %v676_v51 = vsel %vm670_vm7, %v673_v45, %v675_v20  ;;  %v723_v52 = vadd.s32 %v721_v8, %v715_v53  ;;  %vm724_vm13 = vc.u32 %v722_v49, %v718_v16 }
  0xcd   : > { %v588_v61 = vsel %vm586_vm12, %v587_v38, %v585_v7  ;;  %v706_v47 = vadd.s32 %v705_v13, %v695_v24  ;;  %v697_v23 = vshrl.u32 %v692_v10, 16  ;;  %v717_v25 = vshrl.u32 %v713_v36, 16 }
  0xce   : > { %v589_v12 = vclz %v588_v61  ;;  %v725_v46 = vsel %vm724_vm13, 1, %v3507_v31  ;;  %v952_v30 = vand.u32 8388607, %v945_v27  ;;  %v719_v19 = vshrl.u32 %v714_v40, 16 }
  0xcf   : > { %v727_v15 = vadd.s32 %v725_v46, %v723_v52  ;;  %v962_v21 = vshll.u32 %v3509_v29, %v2451_v18  ;;  %v2615_v48 = vadd.s32 %v706_v47, %v697_v23  ;;  %v963_v13 = vshrl.u32 %v3510_v50, %v2471_v60 }
  0xd0   : > { %v2019_v34 = vadd.s32 4294967294, %v589_v12  ;;  %v965_v53 = vshll.u32 %v3510_v50, %v2451_v18  ;;  %v966_v20 = vshrl.u32 %v3511_v32, %v2471_v60  ;;  %v2623_v6 = vadd.s32 %v722_v49, %v718_v16 }
  0xd1   : > { %v728_v10 = vadd.s32 %v727_v15, %v717_v25  ;;  %v953_v40 = vor.u32 8388608, %v952_v30  ;;  %v964_v45 = vor.u32 %v963_v13, %v962_v21  ;;  %v968_v5 = vshll.u32 %v3511_v32, %v2451_v18 }
  0xd2   : > { %vm2020_vm14 = vcmp.lt.s32.totalorder %v2019_v34, 0  ;;  %v967_v24 = vor.u32 %v966_v20, %v965_v53  ;;  %vm485_vm15 = vcmp.lt.s32.totalorder %v2236_v44, 0  ;;  %v730_v61 = vmul.u32 %v2551_v11, %v676_v51 }
  0xd3   : > { %v592_v36 = vsel %vm2020_vm14, 0, %v2019_v34  ;;  %v729_v8 = vadd.s32 %v728_v10, %v719_v19  ;;  %vm732_vm0 = vc.u32 %v2615_v48, %v2623_v6  ;;  %v969_v16 = vshrl.u32 %v3512_v1, %v2471_v60 }
  0xd4   : > { %v593_v38 = vsub.s32 32, %v592_v36  ;;  %v597_v42 = vsub.s32 4294967266, %v592_v36  ;;  %vm977_vm1 = vcmp.lt.s32.totalorder %v2463_v9, 1  ;;  %vm979_vm2 = vcmp.lt.s32.totalorder %v2463_v9, 3 }
  0xd5   : > { %v594_v49 = vshll.u32 %v585_v7, %v592_v36  ;;  %v733_v47 = vadd.s32 1, %v729_v8  ;;  %v970_v52 = vor.u32 %v969_v16, %v968_v5  ;;  %vm978_vm3 = vcmp.lt.s32.totalorder %v2463_v9, 2 }
  0xd6   : > { %v595_v12 = vshrl.u32 %v577_v14, %v593_v38  ;;  %v598_v18 = vadd.s32 127, %v597_v42  ;;  %v985_v11 = vsel %vm977_vm1, %v964_v45, %v967_v24  ;;  %v2638_v51 = vshll.u32 %v953_v40, 8 }
  0xd7   : > { %v734_v46 = vsel %vm732_vm0, %v733_v47, %v729_v8  ;;  %v991_v30 = vsel %vm979_vm2, %v2566_v54, %v990_v33  ;;  %v607_v7 = vsub.s32 4, %v2591_v58  ;;  %v987_v34 = vsel %vm979_vm2, %v970_v52, %v2589_v22 }
  0xd8   : > { %v596_v23 = vor.u32 %v595_v12, %v594_v49  ;;  %v599_v25 = vshll.u32 %v598_v18, 23  ;;  %v735_v14 = vadd.s32 %v734_v46, %v730_v61  ;;  %v989_v19 = vsel %vm977_vm1, %v967_v24, %v970_v52 }
  0xd9   : > { %v818_v15 = vshrl.u32 %v3513_v2, %v2257_v63  ;;  %vm826_vm4 = vcmp.lt.s32.totalorder %v2578_v37, 4  ;;  %v2654_v54 = vsel %vm978_vm3, %v985_v11, %v987_v34  ;;  %v992_v33 = vsel %vm978_vm3, %v989_v19, %v991_v30 }
  0xda   : > { %v600_v21 = vor.u32 4788187, %v599_v25  ;;  %v603_v13 = vcvt.s32.f32 %v596_v23  ;;  %v736_v53 = vadd.s32 536870912, %v735_v14  ;;  %v994_v22 = vand.u32 65535, %v2638_v51 }
  0xdb   : > { %v995_v10 = vshrl.u32 %v2638_v51, 16  ;;  %v996_v40 = vand.u32 65535, %v992_v33  ;;  %v997_v36 = vshrl.u32 %v992_v33, 16  ;;  %v3516_v5 = vand.u32 2147483647, %v2236_v44 }
  0xdc   : > { %v601_v20 = vand.u32 2147483647, %v600_v21  ;;  %v608_v42 = vsel %vm485_vm15, %v607_v7, %v2591_v58  ;;  %v2669_v8 = vshrl.u32 %v736_v53, 30  ;;  %v961_v61 = vshrl.u32 %v3509_v29, %v2471_v60 }
  0xdd   : > { %vm2662_vm5 = vcmp.le.f32.partialorder %v3516_v5, 0.7853982  ;;  %v982_v49 = vsel %vm980_vm6, %v970_v52, 2102212464  ;;  %v999_v12 = vmul.u32 %v997_v36, %v994_v22  ;;  %v2675_v18 = vmul.u32 %v996_v40, %v995_v10 }
  0xde   : > { %v604_v16 = vmul.f32 %v603_v13, %v601_v20  ;;  %v2678_v47 = vor.u32 %v818_v15, %v2582_v55  ;;  %v3519_v11 = vor.u32 %v2266_v4, %v2261_v0  ;;  %v738_v23 = vshll.u32 %v2669_v8, 30 }
  0xdf   : > { %v1019_v60 = vshrl.u32 %v2654_v54, 16  ;;  %v610_v52 = vsel %vm2662_vm5, 0, %v608_v42  ;;  %v998_v46 = vmul.u32 %v996_v40, %v994_v22  ;;  %v1002_v30 = vshll.u32 %v999_v12, 16 }
  0xe0   : > { %v2685_v58 = vsel %vm826_vm4, %v3519_v11, 1326507024  ;;  %v605_v25 = vxor.u32 2147483648, %v604_v16  ;;  %v2691_v7 = vsub.s32 %v735_v14, %v738_v23  ;;  %v981_v55 = vsel %vm977_vm1, %v961_v61, %v964_v45 }
  0xe1   : > { %v983_v0 = vsel %vm979_vm2, %v967_v24, %v982_v49  ;;  %v1018_v4 = vand.u32 65535, %v2654_v54  ;;  %v1004_v19 = vshll.u32 %v2675_v18, 16  ;;  %vm1006_vm6 = vc.u32 %v998_v46, %v1002_v30 }
  0xe2   : > { %v606_v34 = vsel %vm485_vm15, %v605_v25, %v604_v16  ;;  %v1008_v15 = vadd.s32 %v1002_v30, %v998_v46  ;;  %vm740_vm7 = vcmp.lt.s32.totalorder %v2691_v7, 0  ;;  %v741_v45 = vsub.s32 0, %v2691_v7 }
  0xe3   : > { %v2704_v14 = vsel %vm2662_vm5, %v2236_v44, %v606_v34  ;;  %v2708_v21 = vmul.u32 %v1019_v60, %v994_v22  ;;  %v1001_v13 = vmul.u32 %v997_v36, %v995_v10  ;;  %v1007_v53 = vsel %vm1006_vm6, 1, %v3507_v31 }
  0xe4   : > { %v611_v24 = vmul.f32 %v2704_v14, %v2704_v14  ;;  %vm1010_vm9 = vc.u32 %v1008_v15, %v1004_v19  ;;  %v2713_v54 = vand.u32 3, %v610_v52  ;;  %v731_v33 = vadd.s32 %v2623_v6, %v2615_v48 }
  0xe5   : > { %v742_v20 = vsel %vm740_vm7, %v741_v45, %v2691_v7  ;;  %v2718_v40 = vmul.u32 %v1018_v4, %v995_v10  ;;  %v1009_v61 = vadd.s32 %v1007_v53, %v1001_v13  ;;  %v2722_v16 = vsel %vm978_vm3, %v981_v55, %v983_v0 }
  0xe6   : > { %v612_v5 = vmul.f32 -0.001358992, %v611_v24  ;;  %v619_v38 = vmul.f32 -0.00019511016, %v611_v24  ;;  %v743_v42 = vclz %v742_v20  ;;  %v1011_v36 = vsel %vm1010_vm9, 1, %v3507_v31 }
  0xe7   : > { %v1020_v49 = vmul.u32 %v1018_v4, %v994_v22  ;;  %v1024_v11 = vshll.u32 %v2708_v21, 16  ;;  %v1013_v6 = vadd.s32 %v1011_v36, %v1009_v61  ;;  %vm639_vm10 = vcmp.lt.s32.totalorder %v2244_v57, 0 }
  0xe8   : > { %v613_v23 = vadd.f32 0.041655596, %v612_v5  ;;  %v620_v25 = vadd.f32 0.008332121, %v619_v38  ;;  %v2022_v48 = vadd.s32 4294967294, %v743_v42  ;;  %v1003_v52 = vshrl.u32 %v999_v12, 16 }
  0xe9   : > { %v1026_v46 = vshll.u32 %v2718_v40, 16  ;;  %vm1028_vm11 = vc.u32 %v1020_v49, %v1024_v11  ;;  %v1030_v30 = vadd.s32 %v1024_v11, %v1020_v49  ;;  %v1023_v55 = vmul.u32 %v1019_v60, %v995_v10 }
  0xea   : > { %v614_v34 = vmul.f32 %v613_v23, %v611_v24  ;;  %v621_v9 = vmul.f32 %v620_v25, %v611_v24  ;;  %vm2023_vm12 = vcmp.lt.s32.totalorder %v2022_v48, 0  ;;  %v1014_v19 = vadd.s32 %v1013_v6, %v1003_v52 }
  0xeb   : > { %v746_v0 = vsel %vm2023_vm12, 0, %v2022_v48  ;;  %v1029_v22 = vsel %vm1028_vm11, 1, %v3507_v31  ;;  %vm1032_vm13 = vc.u32 %v1030_v30, %v1026_v46  ;;  %v761_v13 = vsub.s32 4, %v2669_v8 }
  0xec   : > { %v615_v4 = vadd.f32 -0.4999988, %v614_v34  ;;  %v622_v15 = vadd.f32 -0.16666654, %v621_v9  ;;  %v747_v45 = vsub.s32 32, %v746_v0  ;;  %vm629_vm14 = vcmp.eq.s32.totalorder %v2713_v54, 0 }
  0xed   : > { %vm632_vm15 = vcmp.eq.s32.totalorder %v2713_v54, 2  ;;  %v751_v12 = vsub.s32 4294967266, %v746_v0  ;;  %v1005_v53 = vshrl.u32 %v2675_v18, 16  ;;  %v1031_v20 = vadd.s32 %v1029_v22, %v1023_v55 }
  0xee   : > { %v1033_v10 = vsel %vm1032_vm13, 1, %v3507_v31  ;;  %v616_v60 = vmul.f32 %v615_v4, %v611_v24  ;;  %v623_v5 = vmul.f32 %v622_v15, %v611_v24  ;;  %vm628_vm0 = vcmp.lt.s32.totalorder %v2713_v54, 2 }
  0xef   : > { %vm1727_vm1 = vcmask 523264   ;;  %v748_v38 = vshll.u32 %v2691_v7, %v746_v0  ;;  %v749_v42 = vshrl.u32 %v731_v33, %v747_v45  ;;  %vm1288_vm2 = vcmp.lt.s32.totalorder %v2422_v35, 4 }
  0xf0   : > { %vm626_vm3 = vweird.f32 %v2236_v44  ;;  %v752_v61 = vadd.s32 127, %v751_v12  ;;  %v2738_v36 = vadd.s32 %v1014_v19, %v1005_v53  ;;  %v1025_v18 = vshrl.u32 %v2708_v21, 16 }
  0xf1   : > { %v1035_v49 = vadd.s32 %v1033_v10, %v1031_v20  ;;  %v617_v11 = vadd.f32 1.0, %v616_v60  ;;  %v624_v23 = vadd.f32 1.0, %v623_v5  ;;  %v750_v25 = vor.u32 %v749_v42, %v748_v38 }
  0xf2   : > { %v791_v24 = vand.u32 2147483647, %v2229_v41  ;;  %v753_v48 = vshll.u32 %v752_v61, 23  ;;  %v1027_v6 = vshrl.u32 %v2718_v40, 16  ;;  %v1034_v7 = vadd.s32 %v1030_v30, %v1026_v46 }
  0xf3   : > { %v1036_v33 = vadd.s32 %v1035_v49, %v1025_v18  ;;  %v625_v52 = vmul.f32 %v624_v23, %v2704_v14  ;;  %v633_v34 = vxor.u32 2147483648, %v617_v11  ;;  %v762_v9 = vsel %vm639_vm10, %v761_v13, %v2669_v8 }
  0xf4   : > { %v1038_v21 = vmul.u32 %v2638_v51, %v2722_v16  ;;  %v754_v55 = vor.u32 4788187, %v753_v48  ;;  %v757_v0 = vcvt.s32.f32 %v750_v25  ;;  %vm1040_vm5 = vc.u32 %v2738_v36, %v1034_v7 }
  0xf5   : > { %v1037_v19 = vadd.s32 %v1036_v33, %v1027_v6  ;;  %v630_v22 = vxor.u32 2147483648, %v625_v52  ;;  %v798_v40 = vand.u32 8388607, %v791_v24  ;;  %v808_v14 = vshll.u32 %v3509_v29, %v2249_v59 }
  0xf6   : > { %v811_v46 = vshll.u32 %v3510_v50, %v2249_v59  ;;  %v755_v30 = vand.u32 2147483647, %v754_v55  ;;  %v809_v51 = vshrl.u32 %v3510_v50, %v2257_v63  ;;  %v812_v16 = vshrl.u32 %v3511_v32, %v2257_v63 }
  0xf7   : > { %v1041_v8 = vadd.s32 1, %v1037_v19  ;;  %v631_v4 = vsel %vm629_vm14, %v617_v11, %v630_v22  ;;  %v634_v15 = vsel %vm632_vm15, %v633_v34, %v625_v52  ;;  %v814_v45 = vshll.u32 %v3511_v32, %v2249_v59 }
  0xf8   : > { %v815_v13 = vshrl.u32 %v3512_v1, %v2257_v63  ;;  %v635_v12 = vsel %vm628_vm0, %v631_v4, %v634_v15  ;;  %v758_v53 = vmul.f32 %v757_v0, %v755_v30  ;;  %v813_v10 = vor.u32 %v812_v16, %v811_v46 }
  0xf9   : > { %v1042_v20 = vsel %vm1040_vm5, %v1041_v8, %v1037_v19  ;;  %v636_v60 = vsel %vm626_vm3, nan, %v635_v12  ;;  %vm823_vm6 = vcmp.lt.s32.totalorder %v2578_v37, 1  ;;  %v799_v59 = vor.u32 8388608, %v798_v40 }
  0xfa   : > { %v1043_v5 = vadd.s32 %v1042_v20, %v1038_v21  ;;  %v816_v38 = vor.u32 %v815_v13, %v814_v45  ;;  %2042 = vmatmul.msk.f32.vlgmr.msrb.gmra.mxu0 %vm1727_vm1, %v636_v60  ;;  %v759_v42 = vxor.u32 2147483648, %v758_v53  ;;  %v810_v61 = vor.u32 %v809_v51, %v808_v14 }
  0xfb   : > { %vm825_vm7 = vcmp.lt.s32.totalorder %v2578_v37, 3  ;;  %v2778_v54 = vsel %vm1288_vm2, %v2443_v56, 920167782  ;;  %v3520_v18 = vand.u32 2147483647, %v2244_v57  ;;  %vm824_vm11 = vcmp.lt.s32.totalorder %v2578_v37, 2 }
  0xfc   : > { %v1044_v49 = vadd.s32 536870912, %v1043_v5  ;;  %v832_v11 = vsel %vm826_vm4, %v2678_v47, 920167782  ;;  %v760_v23 = vsel %vm639_vm10, %v759_v42, %v758_v53  ;;  %v835_v48 = vsel %vm823_vm6, %v813_v10, %v816_v38 }
  0xfd   : > { %vm2782_vm9 = vcmp.le.f32.partialorder %v3520_v18, 0.7853982  ;;  %v807_v52 = vshrl.u32 %v3509_v29, %v2257_v63  ;;  %v837_v34 = vsel %vm825_vm7, %v2678_v47, %v2685_v58  ;;  %v831_v21 = vsel %vm823_vm6, %v810_v61, %v813_v10 }
  0xfe   : > { %v764_v25 = vsel %vm2782_vm9, 0, %v762_v9  ;;  %v2799_v6 = vsel %vm2782_vm9, %v2244_v57, %v760_v23  ;;  %v2801_v33 = vshrl.u32 %v1044_v49, 30  ;;  %v838_v55 = vsel %vm824_vm11, %v835_v48, %v837_v34 }
  0xff   : > { %v765_v9 = vmul.f32 %v2799_v6, %v2799_v6  ;;  %v2815_v0 = vshll.u32 %v799_v59, 8  ;;  %v833_v63 = vsel %vm825_vm7, %v816_v38, %v832_v11  ;;  %v842_v22 = vand.u32 65535, %v838_v55 }
 0x100   : > { %v1046_v19 = vshll.u32 %v2801_v33, 30  ;;  %v843_v40 = vshrl.u32 %v838_v55, 16  ;;  %v3523_v30 = vor.u32 %v2233_v43, %v2226_v39  ;;  %v2829_v51 = vand.u32 3, %v764_v25 }
 0x101   : > { %v766_v14 = vmul.f32 -0.001358992, %v765_v9  ;;  %v773_v47 = vmul.f32 -0.00019511016, %v765_v9  ;;  %v840_v58 = vand.u32 65535, %v2815_v0  ;;  %v841_v46 = vshrl.u32 %v2815_v0, 16 }
 0x102   : > { %v2827_v8 = vsel %vm1288_vm2, %v3523_v30, 1326507024  ;;  %v1039_v16 = vadd.s32 %v1034_v7, %v2738_v36  ;;  %v2832_v4 = vsub.s32 %v1043_v5, %v1046_v19  ;;  %v2836_v13 = vsel %vm823_vm6, %v807_v52, %v810_v61 }
 0x103   : > { %v767_v15 = vadd.f32 0.041655596, %v766_v14  ;;  %v774_v45 = vadd.f32 0.008332121, %v773_v47  ;;  %v834_v12 = vsel %vm824_vm11, %v831_v21, %v833_v63  ;;  %v828_v43 = vsel %vm826_vm4, %v816_v38, 2102212464 }
 0x104   : > { %vm1048_vm10 = vcmp.lt.s32.totalorder %v2832_v4, 0  ;;  %v1049_v39 = vsub.s32 0, %v2832_v4  ;;  %v845_v53 = vmul.u32 %v843_v40, %v840_v58  ;;  %v844_v20 = vmul.u32 %v842_v22, %v840_v58 }
 0x105   : > { %v768_v36 = vmul.f32 %v767_v15, %v765_v9  ;;  %v775_v7 = vmul.f32 %v774_v45, %v765_v9  ;;  %v846_v60 = vmul.u32 %v842_v22, %v841_v46  ;;  %v847_v42 = vmul.u32 %v843_v40, %v841_v46 }
 0x106   : > { %v1050_v5 = vsel %vm1048_vm10, %v1049_v39, %v2832_v4  ;;  %v864_v59 = vand.u32 65535, %v834_v12  ;;  %v865_v61 = vshrl.u32 %v834_v12, 16  ;;  %vm786_vm12 = vcmp.eq.s32.totalorder %v2829_v51, 2 }
 0x107   : > { %v769_v18 = vadd.f32 -0.4999988, %v768_v36  ;;  %v776_v44 = vadd.f32 -0.16666654, %v775_v7  ;;  %v1051_v49 = vclz %v1050_v5  ;;  %v848_v11 = vshll.u32 %v845_v53, 16 }
 0x108   : > { %vm783_vm13 = vcmp.eq.s32.totalorder %v2829_v51, 0  ;;  %v1069_v38 = vsub.s32 4, %v2801_v33  ;;  %v2850_v23 = vsel %vm825_vm7, %v813_v10, %v828_v43  ;;  %v849_v25 = vshrl.u32 %v845_v53, 16 }
 0x109   : > { %v850_v48 = vshll.u32 %v846_v60, 16  ;;  %v770_v52 = vmul.f32 %v769_v18, %v765_v9  ;;  %v777_v34 = vmul.f32 %v776_v44, %v765_v9  ;;  %vm782_vm4 = vcmp.lt.s32.totalorder %v2829_v51, 2 }
 0x10a   : > { %v2028_v21 = vadd.s32 4294967294, %v1051_v49  ;;  %vm852_vm14 = vc.u32 %v844_v20, %v848_v11  ;;  %vm780_vm15 = vweird.f32 %v2244_v57  ;;  %v854_v19 = vadd.s32 %v848_v11, %v844_v20 }
 0x10b   : > { %v853_v55 = vsel %vm852_vm14, 1, %v3507_v31  ;;  %v867_v63 = vmul.u32 %v865_v61, %v840_v58  ;;  %v868_v22 = vmul.u32 %v864_v59, %v841_v46  ;;  %v771_v40 = vadd.f32 1.0, %v770_v52 }
 0x10c   : > { %v778_v14 = vadd.f32 1.0, %v777_v34  ;;  %vm2029_vm0 = vcmp.lt.s32.totalorder %v2028_v21, 0  ;;  %v855_v10 = vadd.s32 %v853_v55, %v847_v42  ;;  %vm856_vm3 = vc.u32 %v854_v19, %v850_v48 }
 0x10d   : > { %v1054_v47 = vsel %vm2029_vm0, 0, %v2028_v21  ;;  %v866_v30 = vmul.u32 %v864_v59, %v840_v58  ;;  %v870_v15 = vshll.u32 %v867_v63, 16  ;;  %v787_v45 = vxor.u32 2147483648, %v771_v40 }
 0x10e   : > { %v779_v9 = vmul.f32 %v778_v14, %v2799_v6  ;;  %v1055_v12 = vsub.s32 32, %v1054_v47  ;;  %v851_v39 = vshrl.u32 %v846_v60, 16  ;;  %v1059_v43 = vsub.s32 4294967266, %v1054_v47 }
 0x10f   : > { %v857_v53 = vsel %vm856_vm3, 1, %v3507_v31  ;;  %v869_v36 = vmul.u32 %v865_v61, %v841_v46  ;;  %v872_v7 = vshll.u32 %v868_v22, 16  ;;  %v1056_v5 = vshll.u32 %v2832_v4, %v1054_v47 }
 0x110   : > { %v784_v20 = vxor.u32 2147483648, %v779_v9  ;;  %v1057_v18 = vshrl.u32 %v1039_v16, %v1055_v12  ;;  %v859_v44 = vadd.s32 %v857_v53, %v855_v10  ;;  %v788_v42 = vsel %vm786_vm12, %v787_v45, %v779_v9 }
 0x111   : > { %vm947_vm5 = vcmp.lt.s32.totalorder %v2254_v62, 0  ;;  %v1060_v58 = vadd.s32 127, %v1059_v43  ;;  %vm874_vm6 = vc.u32 %v866_v30, %v870_v15  ;;  %v876_v6 = vadd.s32 %v870_v15, %v866_v30 }
 0x112   : > { %v785_v60 = vsel %vm783_vm13, %v771_v40, %v784_v20  ;;  %v1058_v59 = vor.u32 %v1057_v18, %v1056_v5  ;;  %v860_v49 = vadd.s32 %v859_v44, %v849_v25  ;;  %v875_v46 = vsel %vm874_vm6, 1, %v3507_v31  ;;  %v3524_v5 = vld [vmem:[#allocation10_spill] sm:$0xff]  ;;  %v3525_v18 = vld [vmem:[#allocation8_spill] sm:$0xff] }
 0x113   : > { %v789_v4 = vsel %vm782_vm4, %v785_v60, %v788_v42  ;;  %v1061_v16 = vshll.u32 %v1060_v58, 23  ;;  %v877_v61 = vadd.s32 %v875_v46, %v869_v36  ;;  %vm878_vm7 = vc.u32 %v876_v6, %v872_v7  ;;  %v3528_v58 = vld [vmem:[#allocation11_spill] sm:$0xff] }
 0x114   : > { %v790_v11 = vsel %vm780_vm15, nan, %v789_v4  ;;  %v861_v48 = vadd.s32 %v860_v49, %v851_v39  ;;  %v871_v52 = vshrl.u32 %v867_v63, 16  ;;  %v879_v34 = vsel %vm878_vm7, 1, %v3507_v31  ;;  %v3529_v4 = vld [vmem:[#allocation9_spill] sm:$0xff] }
 0x115   : > { %2043 = vmatmul.msk.f32.gmra.mxu0 %vm1727_vm1, %v790_v11  ;;  %v1062_v21 = vor.u32 4788187, %v1061_v16  ;;  %v873_v55 = vshrl.u32 %v868_v22, 16  ;;  %v880_v25 = vadd.s32 %v876_v6, %v872_v7  ;;  %v881_v19 = vadd.s32 %v879_v34, %v877_v61 }
 0x116   : > { %v1065_v40 = vcvt.s32.f32 %v1058_v59  ;;  %v1099_v51 = vand.u32 2147483647, %v2191_v17  ;;  %v1116_v14 = vshll.u32 %v3509_v29, %v2201_v26  ;;  %v1117_v57 = vshrl.u32 %v3510_v50, %v2204_v28 }
 0x117   : > { %v1063_v10 = vand.u32 2147483647, %v1062_v21  ;;  %v882_v47 = vadd.s32 %v881_v19, %v871_v52  ;;  %v2875_v63 = vadd.s32 %v880_v25, %v861_v48  ;;  %vm886_vm9 = vc.u32 %v861_v48, %v880_v25 }
 0x118   : > { %v830_v22 = vsel %vm824_vm11, %v2836_v13, %v2850_v23  ;;  %v1106_v30 = vand.u32 8388607, %v1099_v51  ;;  %v1119_v15 = vshll.u32 %v3510_v50, %v2201_v26  ;;  %v1120_v9 = vshrl.u32 %v3511_v32, %v2204_v28 }
 0x119   : > { %v1066_v45 = vmul.f32 %v1065_v40, %v1063_v10  ;;  %v883_v12 = vadd.s32 %v882_v47, %v873_v55  ;;  %v1122_v39 = vshll.u32 %v3511_v32, %v2201_v26  ;;  %v1123_v43 = vshrl.u32 %v3512_v1, %v2204_v28  ;;  %v3530_v40 = vld [vmem:[#allocation12_spill] sm:$0xff] }
 0x11a   : > { %v1070_v37 = vsel %vm947_vm5, %v1069_v38, %v2801_v33  ;;  %v1107_v13 = vor.u32 8388608, %v1106_v30  ;;  %v1118_v23 = vor.u32 %v1117_v57, %v1116_v14  ;;  %v2896_v53 = vor.u32 %v1120_v9, %v1119_v15 }
 0x11b   : > { %v1067_v36 = vxor.u32 2147483648, %v1066_v45  ;;  %v887_v7 = vadd.s32 1, %v883_v12  ;;  %v1124_v20 = vor.u32 %v1123_v43, %v1122_v39  ;;  %vm1133_vm11 = vcmp.lt.s32.totalorder %v2318_v3, 3 }
 0x11c   : > { %v884_v26 = vmul.u32 %v2815_v0, %v830_v22  ;;  %vm1131_vm10 = vcmp.lt.s32.totalorder %v2318_v3, 1  ;;  %v1145_v44 = vsel %vm1133_vm11, %v3525_v18, %v3524_v5  ;;  %v2905_v42 = vshll.u32 %v1107_v13, 8  ;;  %v3531_v22 = vld [vmem:[#allocation13_spill] sm:$0xff] }
 0x11d   : > { %vm2909_vm12 = vcmp.le.f32.partialorder %v945_v27, 0.7853982  ;;  %v1068_v38 = vsel %vm947_vm5, %v1067_v36, %v1066_v45  ;;  %v888_v0 = vsel %vm886_vm9, %v887_v7, %v883_v12  ;;  %vm1132_vm13 = vcmp.lt.s32.totalorder %v2318_v3, 2 }
 0x11e   : > { %v2918_v6 = vshrl.u32 %v3528_v58, 5  ;;  %v2923_v60 = vsel %vm2909_vm12, %v2254_v62, %v1068_v38  ;;  %v1072_v27 = vsel %vm2909_vm12, 0, %v1070_v37  ;;  %v889_v59 = vadd.s32 %v888_v0, %v884_v26  ;;  %v3532_v37 = vld [vmem:[#allocation14_spill] sm:$0xff] }
 0x11f   : > { %v1073_v49 = vmul.f32 %v2923_v60, %v2923_v60  ;;  %v1139_v46 = vsel %vm1131_vm10, %v1118_v23, %v2896_v53  ;;  %v1141_v16 = vsel %vm1133_vm11, %v1124_v20, %v3529_v4  ;;  %v1143_v61 = vsel %vm1131_vm10, %v2896_v53, %v1124_v20 }
 0x120   : > { %v890_v11 = vadd.s32 536870912, %v889_v59  ;;  %v1146_v48 = vsel %vm1132_vm13, %v1143_v61, %v1145_v44  ;;  %v1148_v52 = vand.u32 65535, %v2905_v42  ;;  %v1149_v34 = vshrl.u32 %v2905_v42, 16 }
 0x121   : > { %v1074_v21 = vmul.f32 -0.001358992, %v1073_v49  ;;  %v1081_v55 = vmul.f32 -0.00019511016, %v1073_v49  ;;  %v1115_v25 = vshrl.u32 %v3509_v29, %v2204_v28  ;;  %v1150_v19 = vand.u32 65535, %v1146_v48 }
 0x122   : > { %v2946_v14 = vshll.u32 %v3512_v1, %v3530_v40  ;;  %v2948_v57 = vand.u32 3, %v1072_v27  ;;  %v2950_v10 = vshrl.u32 %v890_v11, 30  ;;  %v1151_v47 = vshrl.u32 %v1146_v48, 16 }
 0x123   : > { %v2953_v30 = vshrl.u32 %v3531_v22, 5  ;;  %v1075_v15 = vadd.f32 0.041655596, %v1074_v21  ;;  %v1082_v9 = vadd.f32 0.008332121, %v1081_v55  ;;  %v1142_v45 = vsel %vm1132_vm13, %v1139_v46, %v1141_v16 }
 0x124   : > { %v892_v28 = vshll.u32 %v2950_v10, 30  ;;  %v1152_v12 = vmul.u32 %v1150_v19, %v1148_v52  ;;  %v1153_v39 = vmul.u32 %v1151_v47, %v1148_v52  ;;  %v1154_v43 = vmul.u32 %v1150_v19, %v1149_v34 }
 0x125   : > { %v2960_v13 = vshrl.u32 %v3513_v2, %v3532_v37  ;;  %v1076_v36 = vmul.f32 %v1075_v15, %v1073_v49  ;;  %v1083_v7 = vmul.f32 %v1082_v9, %v1073_v49  ;;  %v2964_v26 = vsel %vm1131_vm10, %v1115_v25, %v1118_v23 }
 0x126   : > { %vm1094_vm4 = vcmp.eq.s32.totalorder %v2948_v57, 2  ;;  %v2967_v5 = vsub.s32 %v889_v59, %v892_v28  ;;  %v1136_v18 = vsel %vm1134_vm8, %v1124_v20, 2102212464  ;;  %v1156_v44 = vshll.u32 %v1153_v39, 16 }
 0x127   : > { %v1172_v33 = vand.u32 65535, %v1142_v45  ;;  %v1077_v38 = vadd.f32 -0.4999988, %v1076_v36  ;;  %v1084_v0 = vadd.f32 -0.16666654, %v1083_v7  ;;  %v1155_v58 = vmul.u32 %v1151_v47, %v1149_v34 }
 0x128   : > { %v1173_v27 = vshrl.u32 %v1142_v45, 16  ;;  %vm1091_vm14 = vcmp.eq.s32.totalorder %v2948_v57, 0  ;;  %vm894_vm15 = vcmp.lt.s32.totalorder %v2967_v5, 0  ;;  %v895_v23 = vsub.s32 0, %v2967_v5 }
 0x129   : > { %v1158_v46 = vshll.u32 %v1154_v43, 16  ;;  %vm1160_vm0 = vc.u32 %v1152_v12, %v1156_v44  ;;  %v1078_v4 = vmul.f32 %v1077_v38, %v1073_v49  ;;  %v1085_v59 = vmul.f32 %v1084_v0, %v1073_v49 }
 0x12a   : > { %vm1090_vm3 = vcmp.lt.s32.totalorder %v2948_v57, 2  ;;  %v1161_v20 = vsel %vm1160_vm0, 1, %v3507_v31  ;;  %v1162_v16 = vadd.s32 %v1156_v44, %v1152_v12  ;;  %vm1088_vm8 = vweird.f32 %v2254_v62 }
 0x12b   : > { %v896_v61 = vsel %vm894_vm15, %v895_v23, %v2967_v5  ;;  %v1137_v11 = vsel %vm1133_vm11, %v2896_v53, %v1136_v18  ;;  %v1157_v48 = vshrl.u32 %v1153_v39, 16  ;;  %v1159_v21 = vshrl.u32 %v1154_v43, 16 }
 0x12c   : > { %v1079_v55 = vadd.f32 1.0, %v1078_v4  ;;  %v1086_v25 = vadd.f32 1.0, %v1085_v59  ;;  %v897_v19 = vclz %v896_v61  ;;  %v1163_v47 = vadd.s32 %v1161_v20, %v1155_v58  ;;  %v3533_v61 = vld [vmem:[#allocation15_spill] sm:$0xff] }
 0x12d   : > { %vm1164_vm5 = vc.u32 %v1162_v16, %v1158_v46  ;;  %v1174_v49 = vmul.u32 %v1172_v33, %v1148_v52  ;;  %v1175_v22 = vmul.u32 %v1173_v27, %v1148_v52  ;;  %v1176_v15 = vmul.u32 %v1172_v33, %v1149_v34 }
 0x12e   : > { %v1087_v9 = vmul.f32 %v1086_v25, %v2923_v60  ;;  %v1095_v45 = vxor.u32 2147483648, %v1079_v55  ;;  %v2025_v28 = vadd.s32 4294967294, %v897_v19  ;;  %v1165_v12 = vsel %vm1164_vm5, 1, %v3507_v31 }
 0x12f   : > { %v1167_v36 = vadd.s32 %v1165_v12, %v1163_v47  ;;  %v1177_v7 = vmul.u32 %v1173_v27, %v1149_v34  ;;  %v1178_v44 = vshll.u32 %v1175_v22, 16  ;;  %v1180_v53 = vshll.u32 %v1176_v15, 16  ;;  %v3534_v47 = vld [vmem:[#allocation3_spill] sm:$0xff] }
 0x130   : > { %v1092_v39 = vxor.u32 2147483648, %v1087_v9  ;;  %v1096_v43 = vsel %vm1094_vm4, %v1095_v45, %v1087_v9  ;;  %vm2026_vm6 = vcmp.lt.s32.totalorder %v2025_v28, 0  ;;  %v1179_v18 = vshrl.u32 %v1175_v22, 16  ;;  %v3535_v45 = vld [vmem:[#allocation4_spill] sm:$0xff] }
 0x131   : > { %v900_v38 = vsel %vm2026_vm6, 0, %v2025_v28  ;;  %v1168_v0 = vadd.s32 %v1167_v36, %v1157_v48  ;;  %vm1182_vm7 = vc.u32 %v1174_v49, %v1178_v44  ;;  %v1184_v52 = vadd.s32 %v1178_v44, %v1174_v49  ;;  %v3536_v36 = vld [vmem:[#allocation5_spill] sm:$0xff] }
 0x132   : > { %v1093_v60 = vsel %vm1091_vm14, %v1079_v55, %v1092_v39  ;;  %v901_v33 = vsub.s32 32, %v900_v38  ;;  %v902_v58 = vshll.u32 %v2967_v5, %v900_v38  ;;  %v905_v23 = vsub.s32 4294967266, %v900_v38 }
 0x133   : > { %v1097_v34 = vsel %vm1090_vm3, %v1093_v60, %v1096_v43  ;;  %v1169_v27 = vadd.s32 %v1168_v0, %v1159_v21  ;;  %v1183_v46 = vsel %vm1182_vm7, 1, %v3507_v31  ;;  %vm1186_vm9 = vc.u32 %v1184_v52, %v1180_v53 }
 0x134   : > { %v1098_v4 = vsel %vm1088_vm8, nan, %v1097_v34  ;;  %v903_v59 = vshrl.u32 %v2875_v63, %v901_v33  ;;  %v906_v20 = vadd.s32 127, %v905_v23  ;;  %v1185_v16 = vadd.s32 %v1183_v46, %v1177_v7 }
 0x135   : > { %v2996_v48 = vshll.u32 %v3512_v1, %v3533_v61  ;;  %2045 = vmatmul.msk.f32.vlgmr.msra.gmra.mxu1 %vm1727_vm1, %v1098_v4  ;;  %v1181_v5 = vshrl.u32 %v1176_v15, 16  ;;  %v1187_v57 = vsel %vm1186_vm9, 1, %v3507_v31  ;;  %v1188_v21 = vadd.s32 %v1184_v52, %v1180_v53 }
 0x136   : > { %v904_v55 = vor.u32 %v903_v59, %v902_v58  ;;  %v907_v25 = vshll.u32 %v906_v20, 23  ;;  %v1189_v19 = vadd.s32 %v1187_v57, %v1185_v16  ;;  %v1253_v62 = vand.u32 2147483647, %v3534_v47 }
 0x137   : > { %vm793_vm11 = vcmp.lt.s32.totalorder %v2229_v41, 0  ;;  %v1138_v63 = vsel %vm1132_vm13, %v2964_v26, %v1137_v11  ;;  %v3005_v49 = vadd.s32 %v1188_v21, %v1169_v27  ;;  %vm1194_vm10 = vc.u32 %v1169_v27, %v1188_v21 }
 0x138   : > { %v908_v22 = vor.u32 4788187, %v907_v25  ;;  %v1190_v9 = vadd.s32 %v1189_v19, %v1179_v18  ;;  %v1260_v15 = vand.u32 8388607, %v1253_v62  ;;  %v1270_v28 = vshll.u32 %v3509_v29, %v3535_v45 }
 0x139   : > { %v915_v12 = vsub.s32 4, %v2950_v10  ;;  %v1271_v7 = vshrl.u32 %v3510_v50, %v3536_v36  ;;  %v1273_v3 = vshll.u32 %v3510_v50, %v3535_v45  ;;  %v1274_v26 = vshrl.u32 %v3511_v32, %v3536_v36 }
 0x13a   : > { %v909_v11 = vand.u32 2147483647, %v908_v22  ;;  %v911_v44 = vcvt.s32.f32 %v904_v55  ;;  %v1191_v53 = vadd.s32 %v1190_v9, %v1181_v5  ;;  %v1261_v39 = vor.u32 8388608, %v1260_v15 }
 0x13b   : > { %v1192_v43 = vmul.u32 %v2905_v42, %v1138_v63  ;;  %v1275_v18 = vor.u32 %v1274_v26, %v1273_v3  ;;  %v1276_v38 = vshll.u32 %v3511_v32, %v3535_v45  ;;  %v1277_v0 = vshrl.u32 %v3512_v1, %v3536_v36  ;;  %v3539_v63 = vld [vmem:[#allocation18_spill] sm:$0xff] }
 0x13c   : > { %v912_v52 = vmul.f32 %v911_v44, %v909_v11  ;;  %v1195_v60 = vadd.s32 1, %v1191_v53  ;;  %v1272_v33 = vor.u32 %v1271_v7, %v1270_v28  ;;  %vm1285_vm12 = vcmp.lt.s32.totalorder %v2422_v35, 1 }
 0x13d   : > { %v916_v58 = vsel %vm793_vm11, %v915_v12, %v2950_v10  ;;  %v1278_v23 = vor.u32 %v1277_v0, %v1276_v38  ;;  %vm1286_vm13 = vcmp.lt.s32.totalorder %v2422_v35, 2  ;;  %vm1287_vm4 = vcmp.lt.s32.totalorder %v2422_v35, 3 }
 0x13e   : > { %v913_v42 = vxor.u32 2147483648, %v912_v52  ;;  %v1196_v34 = vsel %vm1194_vm10, %v1195_v60, %v1191_v53  ;;  %v1299_v46 = vsel %vm1287_vm4, %v2443_v56, %v2827_v8  ;;  %v3034_v4 = vshll.u32 %v1261_v39, 8 }
 0x13f   : > { %v3038_v59 = vor.u32 %v2960_v13, %v2946_v14  ;;  %vm3042_vm14 = vcmp.le.f32.partialorder %v791_v24, 0.7853982  ;;  %v1197_v20 = vadd.s32 %v1196_v34, %v1192_v43  ;;  %v1297_v27 = vsel %vm1285_vm12, %v1275_v18, %v1278_v23 }
 0x140   : > { %v914_v16 = vsel %vm793_vm11, %v913_v42, %v912_v52  ;;  %v918_v56 = vsel %vm3042_vm14, 0, %v916_v58  ;;  %v1293_v8 = vsel %vm1285_vm12, %v1272_v33, %v1275_v18  ;;  %v1300_v14 = vsel %vm1286_vm13, %v1297_v27, %v1299_v46 }
 0x141   : > { %v3059_v24 = vsel %vm3042_vm14, %v2229_v41, %v914_v16  ;;  %v1198_v13 = vadd.s32 536870912, %v1197_v20  ;;  %v1295_v5 = vsel %vm1287_vm4, %v1278_v23, %v2778_v54  ;;  %v1302_v57 = vand.u32 65535, %v3034_v4 }
 0x142   : > { %v919_v21 = vmul.f32 %v3059_v24, %v3059_v24  ;;  %v1303_v55 = vshrl.u32 %v3034_v4, 16  ;;  %v1304_v25 = vand.u32 65535, %v1300_v14  ;;  %v1305_v19 = vshrl.u32 %v1300_v14, 16 }
 0x143   : > { %v3070_v22 = vshrl.u32 %v3513_v2, %v3539_v63  ;;  %v3072_v9 = vshrl.u32 %v1198_v13, 30  ;;  %v1269_v15 = vshrl.u32 %v3509_v29, %v3536_v36  ;;  %v1290_v54 = vsel %vm1288_vm2, %v1278_v23, 2102212464 }
 0x144   : > { %v920_v45 = vmul.f32 -0.001358992, %v919_v21  ;;  %v927_v28 = vmul.f32 -0.00019511016, %v919_v21  ;;  %v1306_v12 = vmul.u32 %v1304_v25, %v1302_v57  ;;  %v1307_v7 = vmul.u32 %v1305_v19, %v1302_v57 }
 0x145   : > { %v3078_v3 = vand.u32 3, %v918_v56  ;;  %v1200_v26 = vshll.u32 %v3072_v9, 30  ;;  %v1296_v2 = vsel %vm1286_vm13, %v1293_v8, %v1295_v5  ;;  %v1308_v11 = vmul.u32 %v1304_v25, %v1303_v55 }
 0x146   : > { %v921_v44 = vadd.f32 0.041655596, %v920_v45  ;;  %v928_v53 = vadd.f32 0.008332121, %v927_v28  ;;  %v1309_v39 = vmul.u32 %v1305_v19, %v1303_v55  ;;  %v1310_v43 = vshll.u32 %v1307_v7, 16 }
 0x147   : > { %v3083_v36 = vsub.s32 %v1197_v20, %v1200_v26  ;;  %v1289_v38 = vsel %vm1285_vm12, %v1269_v15, %v1272_v33  ;;  %v1291_v0 = vsel %vm1287_vm4, %v1275_v18, %v1290_v54  ;;  %v1326_v52 = vand.u32 65535, %v1296_v2 }
 0x148   : > { %v922_v60 = vmul.f32 %v921_v44, %v919_v21  ;;  %v929_v58 = vmul.f32 %v928_v53, %v919_v21  ;;  %v1312_v23 = vshll.u32 %v1308_v11, 16  ;;  %vm1314_vm2 = vc.u32 %v1306_v12, %v1310_v43 }
 0x149   : > { %vm1202_vm15 = vcmp.lt.s32.totalorder %v3083_v36, 0  ;;  %v1203_v42 = vsub.s32 0, %v3083_v36  ;;  %v1315_v34 = vsel %vm1314_vm2, 1, %v3507_v31  ;;  %v1327_v46 = vshrl.u32 %v1296_v2, 16 }
 0x14a   : > { %v923_v10 = vadd.f32 -0.4999988, %v922_v60  ;;  %v930_v20 = vadd.f32 -0.16666654, %v929_v58  ;;  %v1316_v27 = vadd.s32 %v1310_v43, %v1306_v12  ;;  %v1317_v16 = vadd.s32 %v1315_v34, %v1309_v39 }
 0x14b   : > { %vm937_vm0 = vcmp.eq.s32.totalorder %v3078_v3, 0  ;;  %vm940_vm3 = vcmp.eq.s32.totalorder %v3078_v3, 2  ;;  %v1204_v18 = vsel %vm1202_vm15, %v1203_v42, %v3083_v36  ;;  %v3097_v33 = vsel %vm1286_vm13, %v1289_v38, %v1291_v0 }
 0x14c   : > { %v1311_v56 = vshrl.u32 %v1307_v7, 16  ;;  %v924_v8 = vmul.f32 %v923_v10, %v919_v21  ;;  %v931_v14 = vmul.f32 %v930_v20, %v919_v21  ;;  %vm936_vm8 = vcmp.lt.s32.totalorder %v3078_v3, 2  ;;  %v3541_v3 = vld [vmem:[#allocation20_spill] sm:$0xff] }
 0x14d   : > { %v1205_v13 = vclz %v1204_v18  ;;  %vm1318_vm5 = vc.u32 %v1316_v27, %v1312_v23  ;;  %vm934_vm6 = vweird.f32 %v2229_v41  ;;  %v1328_v25 = vmul.u32 %v1326_v52, %v1302_v57 }
 0x14e   : > { %v1319_v5 = vsel %vm1318_vm5, 1, %v3507_v31  ;;  %v1329_v19 = vmul.u32 %v1327_v46, %v1302_v57  ;;  %v1330_v15 = vmul.u32 %v1326_v52, %v1303_v55  ;;  %v925_v54 = vadd.f32 1.0, %v924_v8 }
 0x14f   : > { %v932_v45 = vadd.f32 1.0, %v931_v14  ;;  %v2031_v28 = vadd.s32 4294967294, %v1205_v13  ;;  %v1321_v35 = vadd.s32 %v1319_v5, %v1317_v16  ;;  %vm1442_vm7 = vcmp.lt.s32.totalorder %v2953_v30, 4  ;;  %v3542_v5 = vld [vmem:[#allocation19_spill] sm:$0xff] }
 0x150   : > { %v1313_v12 = vshrl.u32 %v1308_v11, 16  ;;  %v1331_v7 = vmul.u32 %v1327_v46, %v1303_v55  ;;  %v1332_v21 = vshll.u32 %v1329_v19, 16  ;;  %v1334_v26 = vshll.u32 %v1330_v15, 16 }
 0x151   : > { %v933_v2 = vmul.f32 %v932_v45, %v3059_v24  ;;  %v941_v44 = vxor.u32 2147483648, %v925_v54  ;;  %vm2032_vm9 = vcmp.lt.s32.totalorder %v2031_v28, 0  ;;  %v1322_v53 = vadd.s32 %v1321_v35, %v1311_v56  ;;  %v3540_v56 = vld [vmem:[#allocation7_spill] sm:$0xff] }
 0x152   : > { %v1208_v39 = vsel %vm2032_vm9, 0, %v2031_v28  ;;  %v1333_v43 = vshrl.u32 %v1329_v19, 16  ;;  %vm1336_vm11 = vc.u32 %v1328_v25, %v1332_v21  ;;  %v1338_v57 = vadd.s32 %v1332_v21, %v1328_v25 }
 0x153   : > { %v938_v38 = vxor.u32 2147483648, %v933_v2  ;;  %v942_v0 = vsel %vm940_vm3, %v941_v44, %v933_v2  ;;  %v1209_v52 = vsub.s32 32, %v1208_v39  ;;  %v1210_v60 = vshll.u32 %v3083_v36, %v1208_v39 }
 0x154   : > { %v1213_v11 = vsub.s32 4294967266, %v1208_v39  ;;  %v1323_v55 = vadd.s32 %v1322_v53, %v1313_v12  ;;  %v1337_v58 = vsel %vm1336_vm11, 1, %v3507_v31  ;;  %vm1340_vm10 = vc.u32 %v1338_v57, %v1334_v26 }
 0x155   : > { %v939_v24 = vsel %vm937_vm0, %v925_v54, %v938_v38  ;;  %v1211_v23 = vshrl.u32 %v3005_v49, %v1209_v52  ;;  %v1339_v42 = vadd.s32 %v1337_v58, %v1331_v7  ;;  %v1341_v34 = vsel %vm1340_vm10, 1, %v3507_v31 }
 0x156   : > { %v943_v46 = vsel %vm936_vm8, %v939_v24, %v942_v0  ;;  %v1214_v10 = vadd.s32 127, %v1213_v11  ;;  %v1335_v20 = vshrl.u32 %v1330_v15, 16  ;;  %v1342_v27 = vadd.s32 %v1338_v57, %v1334_v26 }
 0x157   : > { %v944_v36 = vsel %vm934_vm6, nan, %v943_v46  ;;  %v1212_v16 = vor.u32 %v1211_v23, %v1210_v60  ;;  %v1343_v18 = vadd.s32 %v1341_v34, %v1339_v42  ;;  %v1407_v8 = vand.u32 2147483647, %v3540_v56 }
 0x158   : > { %v1435_v14 = vor.u32 %v3070_v22, %v2996_v48  ;;  %2044 = vmatmul.msk.f32.gmra.mxu0 %vm1727_vm1, %v944_v36  ;;  %v1215_v49 = vshll.u32 %v1214_v10, 23  ;;  %v3120_v13 = vadd.s32 %v1342_v27, %v1323_v55  ;;  %vm1348_vm12 = vc.u32 %v1323_v55, %v1342_v27 }
 0x159   : > { %v3543_v25 = vor.u32 %v3541_v3, %v3542_v5  ;;  %v1344_v19 = vadd.s32 %v1343_v18, %v1333_v43  ;;  %v1346_v15 = vmul.u32 %v3034_v4, %v3097_v33  ;;  %v1414_v54 = vand.u32 8388607, %v1407_v8 }
 0x15a   : > { %v1216_v48 = vor.u32 4788187, %v1215_v49  ;;  %v1219_v22 = vcvt.s32.f32 %v1212_v16  ;;  %v1424_v45 = vshll.u32 %v3509_v29, %v3533_v61  ;;  %v1425_v28 = vshrl.u32 %v3510_v50, %v3539_v63 }
 0x15b   : > { %v1452_v41 = vsel %vm1442_vm7, %v3543_v25, 1326507024  ;;  %v1345_v35 = vadd.s32 %v1344_v19, %v1335_v20  ;;  %v1415_v12 = vor.u32 8388608, %v1414_v54  ;;  %v1427_v7 = vshll.u32 %v3510_v50, %v3533_v61 }
 0x15c   : > { %v1428_v21 = vshrl.u32 %v3511_v32, %v3539_v63  ;;  %vm1596_vm13 = vcmp.lt.s32.totalorder %v2918_v6, 4  ;;  %v1217_v4 = vand.u32 2147483647, %v1216_v48  ;;  %v1223_v33 = vsub.s32 4, %v3072_v9 }
 0x15d   : > { %v1430_v26 = vshll.u32 %v3511_v32, %v3533_v61  ;;  %v1431_v2 = vshrl.u32 %v3512_v1, %v3539_v63  ;;  %vm1101_vm4 = vcmp.lt.s32.totalorder %v2191_v17, 0  ;;  %v1349_v44 = vadd.s32 1, %v1345_v35 }
 0x15e   : > { %v3146_v53 = vor.u32 %v1425_v28, %v1424_v45  ;;  %v3148_v39 = vor.u32 %v1428_v21, %v1427_v7  ;;  %v1448_v43 = vsel %vm1442_vm7, %v1435_v14, 920167782  ;;  %v1220_v57 = vmul.f32 %v1219_v22, %v1217_v4 }
 0x15f   : > { %v1432_v38 = vor.u32 %v1431_v2, %v1430_v26  ;;  %vm1441_vm14 = vcmp.lt.s32.totalorder %v2953_v30, 3  ;;  %vm3155_vm2 = vcmp.le.f32.partialorder %v1099_v51, 0.7853982  ;;  %v1350_v0 = vsel %vm1348_vm12, %v1349_v44, %v1345_v35 }
 0x160   : > { %v1453_v52 = vsel %vm1441_vm14, %v1435_v14, %v1452_v41  ;;  %v3162_v60 = vshll.u32 %v1415_v12, 8  ;;  %v1221_v11 = vxor.u32 2147483648, %v1220_v57  ;;  %v1224_v58 = vsel %vm1101_vm4, %v1223_v33, %v3072_v9 }
 0x161   : > { %v1351_v24 = vadd.s32 %v1350_v0, %v1346_v15  ;;  %vm1439_vm15 = vcmp.lt.s32.totalorder %v2953_v30, 1  ;;  %vm1440_vm0 = vcmp.lt.s32.totalorder %v2953_v30, 2  ;;  %v1449_v55 = vsel %vm1441_vm14, %v1432_v38, %v1448_v43 }
 0x162   : > { %v1447_v51 = vsel %vm1439_vm15, %v3146_v53, %v3148_v39  ;;  %v1451_v23 = vsel %vm1439_vm15, %v3148_v39, %v1432_v38  ;;  %v1222_v9 = vsel %vm1101_vm4, %v1221_v11, %v1220_v57  ;;  %v1456_v46 = vand.u32 65535, %v3162_v60 }
 0x163   : > { %v1352_v42 = vadd.s32 536870912, %v1351_v24  ;;  %v1454_v34 = vsel %vm1440_vm0, %v1451_v23, %v1453_v52  ;;  %v1225_v10 = vsel %vm3155_vm2, %v2191_v17, %v1222_v9  ;;  %v1457_v20 = vshrl.u32 %v3162_v60, 16 }
 0x164   : > { %v1458_v27 = vand.u32 65535, %v1454_v34  ;;  %v1459_v36 = vshrl.u32 %v1454_v34, 16  ;;  %v1226_v16 = vsel %vm3155_vm2, 0, %v1224_v58  ;;  %v1227_v18 = vmul.f32 %v1225_v10, %v1225_v10 }
 0x165   : > { %v3189_v14 = vshrl.u32 %v1352_v42, 30  ;;  %v1450_v49 = vsel %vm1440_vm0, %v1447_v51, %v1449_v55  ;;  %v3196_v3 = vsel %vm1596_vm13, %v3038_v59, 920167782  ;;  %v3199_v54 = vand.u32 3, %v1226_v16 }
 0x166   : > { %v1461_v5 = vmul.u32 %v1459_v36, %v1456_v46  ;;  %v1462_v25 = vmul.u32 %v1458_v27, %v1457_v20  ;;  %v1228_v41 = vmul.f32 -0.001358992, %v1227_v18  ;;  %v1235_v19 = vmul.f32 -0.00019511016, %v1227_v18 }
 0x167   : > { %v1354_v15 = vshll.u32 %v3189_v14, 30  ;;  %v1460_v48 = vmul.u32 %v1458_v27, %v1456_v46  ;;  %v1481_v45 = vshrl.u32 %v1450_v49, 16  ;;  %v1480_v7 = vand.u32 65535, %v1450_v49 }
 0x168   : > { %v1464_v22 = vshll.u32 %v1461_v5, 16  ;;  %v1229_v28 = vadd.f32 0.041655596, %v1228_v41  ;;  %v1236_v35 = vadd.f32 0.008332121, %v1235_v19  ;;  %v1463_v21 = vmul.u32 %v1459_v36, %v1457_v20 }
 0x169   : > { %v3201_v12 = vsub.s32 %v1351_v24, %v1354_v15  ;;  %v1466_v4 = vshll.u32 %v1462_v25, 16  ;;  %vm1248_vm5 = vcmp.eq.s32.totalorder %v3199_v54, 2  ;;  %v1423_v43 = vshrl.u32 %v3509_v29, %v3539_v63 }
 0x16a   : > { %vm1468_vm3 = vc.u32 %v1460_v48, %v1464_v22  ;;  %v1470_v33 = vadd.s32 %v1464_v22, %v1460_v48  ;;  %v1230_v26 = vmul.f32 %v1229_v28, %v1227_v18  ;;  %v1237_v2 = vmul.f32 %v1236_v35, %v1227_v18 }
 0x16b   : > { %vm1356_vm8 = vcmp.lt.s32.totalorder %v3201_v12, 0  ;;  %v1357_v44 = vsub.s32 0, %v3201_v12  ;;  %v1469_v57 = vsel %vm1468_vm3, 1, %v3507_v31  ;;  %v3209_v61 = vmul.u32 %v1481_v45, %v1456_v46 }
 0x16c   : > { %vm1472_vm6 = vc.u32 %v1470_v33, %v1466_v4  ;;  %v1231_v0 = vadd.f32 -0.4999988, %v1230_v26  ;;  %v1238_v52 = vadd.f32 -0.16666654, %v1237_v2  ;;  %v1471_v58 = vadd.s32 %v1469_v57, %v1463_v21 }
 0x16d   : > { %v1358_v11 = vsel %vm1356_vm8, %v1357_v44, %v3201_v12  ;;  %vm1245_vm9 = vcmp.eq.s32.totalorder %v3199_v54, 0  ;;  %v1443_v51 = vsel %vm1439_vm15, %v1423_v43, %v3146_v53  ;;  %v1444_v63 = vsel %vm1442_vm7, %v1432_v38, 2102212464  ;;  %v3546_v43 = vld [vmem:[#allocation6_spill] sm:$0xff] }
 0x16e   : > { %v1359_v24 = vclz %v1358_v11  ;;  %v1465_v55 = vshrl.u32 %v1461_v5, 16  ;;  %v1232_v23 = vmul.f32 %v1231_v0, %v1227_v18  ;;  %v1239_v9 = vmul.f32 %v1238_v52, %v1227_v18 }
 0x16f   : > { %vm1244_vm11 = vcmp.lt.s32.totalorder %v3199_v54, 2  ;;  %v1473_v42 = vsel %vm1472_vm6, 1, %v3507_v31  ;;  %v1484_v34 = vmul.u32 %v1480_v7, %v1457_v20  ;;  %vm1242_vm10 = vweird.f32 %v2191_v17 }
 0x170   : > { %v2034_v27 = vadd.s32 4294967294, %v1359_v24  ;;  %v1475_v36 = vadd.s32 %v1473_v42, %v1471_v58  ;;  %v1482_v16 = vmul.u32 %v1480_v7, %v1456_v46  ;;  %v1486_v49 = vshll.u32 %v3209_v61, 16 }
 0x171   : > { %v1233_v41 = vadd.f32 1.0, %v1232_v23  ;;  %v1240_v53 = vadd.f32 1.0, %v1239_v9  ;;  %v1467_v19 = vshrl.u32 %v1462_v25, 16  ;;  %v1485_v15 = vmul.u32 %v1481_v45, %v1457_v20 }
 0x172   : > { %vm2035_vm7 = vcmp.lt.s32.totalorder %v2034_v27, 0  ;;  %v1476_v38 = vadd.s32 %v1475_v36, %v1465_v55  ;;  %v1488_v5 = vshll.u32 %v1484_v34, 16  ;;  %vm1490_vm12 = vc.u32 %v1482_v16, %v1486_v49 }
 0x173   : > { %v1241_v18 = vmul.f32 %v1240_v53, %v1225_v10  ;;  %v1249_v48 = vxor.u32 2147483648, %v1233_v41  ;;  %v1362_v22 = vsel %vm2035_vm7, 0, %v2034_v27  ;;  %v1491_v28 = vsel %vm1490_vm12, 1, %v3507_v31 }
 0x174   : > { %v1363_v35 = vsub.s32 32, %v1362_v22  ;;  %v1364_v21 = vshll.u32 %v3201_v12, %v1362_v22  ;;  %v1367_v4 = vsub.s32 4294967266, %v1362_v22  ;;  %v1477_v46 = vadd.s32 %v1476_v38, %v1467_v19 }
 0x175   : > { %v1246_v7 = vxor.u32 2147483648, %v1241_v18  ;;  %v1250_v33 = vsel %vm1248_vm5, %v1249_v48, %v1241_v18  ;;  %v1492_v25 = vadd.s32 %v1486_v49, %v1482_v16  ;;  %v1493_v20 = vadd.s32 %v1491_v28, %v1485_v15 }
 0x176   : > { %v1365_v45 = vshrl.u32 %v3120_v13, %v1363_v35  ;;  %v1368_v26 = vadd.s32 127, %v1367_v4  ;;  %v1445_v10 = vsel %vm1441_vm14, %v3148_v39, %v1444_v63  ;;  %v1487_v2 = vshrl.u32 %v3209_v61, 16  ;;  %v3547_v61 = vld [vmem:[#allocation17_spill] sm:$0xff]  ;;  %v3548_v63 = vld [vmem:[#allocation16_spill] sm:$0xff] }
 0x177   : > { %v1247_v12 = vsel %vm1245_vm9, %v1233_v41, %v1246_v7  ;;  %vm1494_vm4 = vc.u32 %v1492_v25, %v1488_v5  ;;  %v1496_v44 = vadd.s32 %v1492_v25, %v1488_v5  ;;  %v1561_v57 = vand.u32 2147483647, %v3546_v43 }
 0x178   : > { %v1251_v0 = vsel %vm1244_vm11, %v1247_v12, %v1250_v33  ;;  %v1366_v52 = vor.u32 %v1365_v45, %v1364_v21  ;;  %v1369_v11 = vshll.u32 %v1368_v26, 23  ;;  %v1495_v13 = vsel %vm1494_vm4, 1, %v3507_v31 }
 0x179   : > { %v1252_v58 = vsel %vm1242_vm10, nan, %v1251_v0  ;;  %v1497_v39 = vadd.s32 %v1495_v13, %v1493_v20  ;;  %v3239_v24 = vadd.s32 %v1496_v44, %v1477_v46  ;;  %vm1502_vm14 = vc.u32 %v1477_v46, %v1496_v44 }
 0x17a   : > { %v3549_v55 = vor.u32 %v3547_v61, %v3548_v63  ;;  %2046 = vmatmul.msk.f32.gmra.mxu1 %vm1727_vm1, %v1252_v58  ;;  %v1370_v54 = vor.u32 4788187, %v1369_v11  ;;  %v1373_v9 = vcvt.s32.f32 %v1366_v52  ;;  %v1446_v42 = vsel %vm1440_vm0, %v1443_v51, %v1445_v10 }
 0x17b   : > { %v1489_v27 = vshrl.u32 %v1484_v34, 16  ;;  %v1498_v17 = vadd.s32 %v1497_v39, %v1487_v2  ;;  %v1568_v36 = vand.u32 8388607, %v1561_v57  ;;  %v1578_v16 = vshll.u32 %v3509_v29, %v3530_v40 }
 0x17c   : > { %v1606_v23 = vsel %vm1596_vm13, %v3549_v55, 1326507024  ;;  %v1371_v49 = vand.u32 2147483647, %v1370_v54  ;;  %v1579_v41 = vshrl.u32 %v3510_v50, %v3532_v37  ;;  %v1581_v53 = vshll.u32 %v3510_v50, %v3530_v40 }
 0x17d   : > { %v1582_v19 = vshrl.u32 %v3511_v32, %v3532_v37  ;;  %v1377_v30 = vsub.s32 4, %v3189_v14  ;;  %v1499_v51 = vadd.s32 %v1498_v17, %v1489_v27  ;;  %v1584_v34 = vshll.u32 %v3511_v32, %v3530_v40 }
 0x17e   : > { %v1585_v15 = vshrl.u32 %v3512_v1, %v3532_v37  ;;  %vm1255_vm2 = vcmp.lt.s32.totalorder %v3534_v47, 0  ;;  %v1374_v38 = vmul.f32 %v1373_v9, %v1371_v49  ;;  %v3265_v5 = vor.u32 %v1579_v41, %v1578_v16 }
 0x17f   : > { %v3267_v18 = vor.u32 %v1582_v19, %v1581_v53  ;;  %v1503_v50 = vadd.s32 1, %v1499_v51  ;;  %v1569_v48 = vor.u32 8388608, %v1568_v36  ;;  %vm1595_vm15 = vcmp.lt.s32.totalorder %v2918_v6, 3 }
 0x180   : > { %v3269_v22 = vor.u32 %v1585_v15, %v1584_v34  ;;  %v1375_v28 = vxor.u32 2147483648, %v1374_v38  ;;  %v1500_v35 = vmul.u32 %v3162_v60, %v1446_v42  ;;  %vm1593_vm0 = vcmp.lt.s32.totalorder %v2918_v6, 1 }
 0x181   : > { %v1607_v32 = vsel %vm1595_vm15, %v3038_v59, %v1606_v23  ;;  %vm3279_vm3 = vcmp.le.f32.partialorder %v1253_v62, 0.7853982  ;;  %v1378_v40 = vsel %vm1255_vm2, %v1377_v30, %v3189_v14  ;;  %v1504_v21 = vsel %vm1502_vm14, %v1503_v50, %v1499_v51 }
 0x182   : > { %v1605_v60 = vsel %vm1593_vm0, %v3267_v18, %v3269_v22  ;;  %v1376_v59 = vsel %vm1255_vm2, %v1375_v28, %v1374_v38  ;;  %v1505_v4 = vadd.s32 %v1504_v21, %v1500_v35  ;;  %vm1594_vm8 = vcmp.lt.s32.totalorder %v2918_v6, 2 }
 0x183   : > { %v1601_v62 = vsel %vm1593_vm0, %v3265_v5, %v3267_v18  ;;  %v1379_v14 = vsel %vm3279_vm3, %v3534_v47, %v1376_v59  ;;  %v1603_v46 = vsel %vm1595_vm15, %v3269_v22, %v3196_v3  ;;  %v1608_v7 = vsel %vm1594_vm8, %v1605_v60, %v1607_v32 }
 0x184   : > { %v3307_v33 = vshll.u32 %v1569_v48, 8  ;;  %v1381_v25 = vmul.f32 %v1379_v14, %v1379_v14  ;;  %v1506_v20 = vadd.s32 536870912, %v1505_v4  ;;  %v1612_v45 = vand.u32 65535, %v1608_v7 }
 0x185   : > { %v1613_v26 = vshrl.u32 %v1608_v7, 16  ;;  %v1380_v10 = vsel %vm3279_vm3, 0, %v1378_v40  ;;  %v1604_v3 = vsel %vm1594_vm8, %v1601_v62, %v1603_v46  ;;  %vm1396_vm11 = vweird.f32 %v3534_v47 }
 0x186   : > { %v1610_v2 = vand.u32 65535, %v3307_v33  ;;  %v1611_v12 = vshrl.u32 %v3307_v33, 16  ;;  %v1382_v44 = vmul.f32 -0.001358992, %v1381_v25  ;;  %v1389_v0 = vmul.f32 -0.00019511016, %v1381_v25 }
 0x187   : > { %v3313_v52 = vshrl.u32 %v1506_v20, 30  ;;  %v1397_v63 = vand.u32 3, %v1380_v10  ;;  %v1635_v54 = vshrl.u32 %v1604_v3, 16  ;;  %v1634_v17 = vand.u32 65535, %v1604_v3 }
 0x188   : > { %v1615_v11 = vmul.u32 %v1613_v26, %v1610_v2  ;;  %v1616_v13 = vmul.u32 %v1612_v45, %v1611_v12  ;;  %v1383_v58 = vadd.f32 0.041655596, %v1382_v44  ;;  %v1390_v39 = vadd.f32 0.008332121, %v1389_v0 }
 0x189   : > { %v1508_v61 = vshll.u32 %v3313_v52, 30  ;;  %v1614_v55 = vmul.u32 %v1612_v45, %v1610_v2  ;;  %v1617_v36 = vmul.u32 %v1613_v26, %v1611_v12  ;;  %v1637_v51 = vmul.u32 %v1635_v54, %v1610_v2 }
 0x18a   : > { %v1618_v23 = vshll.u32 %v1615_v11, 16  ;;  %v1384_v9 = vmul.f32 %v1383_v58, %v1381_v25  ;;  %v1391_v42 = vmul.f32 %v1390_v39, %v1381_v25  ;;  %v1620_v16 = vshll.u32 %v1616_v13, 16 }
 0x18b   : > { %v1509_v27 = vsub.s32 %v1505_v4, %v1508_v61  ;;  %vm1398_vm10 = vcmp.lt.s32.totalorder %v1397_v63, 2  ;;  %v1619_v28 = vshrl.u32 %v1615_v11, 16  ;;  %v1636_v40 = vmul.u32 %v1634_v17, %v1610_v2 }
 0x18c   : > { %vm1622_vm5 = vc.u32 %v1614_v55, %v1618_v23  ;;  %v1624_v49 = vadd.s32 %v1618_v23, %v1614_v55  ;;  %v1385_v41 = vadd.f32 -0.4999988, %v1384_v9  ;;  %v1392_v53 = vadd.f32 -0.16666654, %v1391_v42 }
 0x18d   : > { %vm1510_vm6 = vcmp.lt.s32.totalorder %v1509_v27, 0  ;;  %v1511_v19 = vsub.s32 0, %v1509_v27  ;;  %v1623_v30 = vsel %vm1622_vm5, 1, %v3507_v31  ;;  %v1638_v59 = vmul.u32 %v1634_v17, %v1611_v12 }
 0x18e   : > { %vm1626_vm9 = vc.u32 %v1624_v49, %v1620_v16  ;;  %v1386_v34 = vmul.f32 %v1385_v41, %v1381_v25  ;;  %v1393_v15 = vmul.f32 %v1392_v53, %v1381_v25  ;;  %v1625_v50 = vadd.s32 %v1623_v30, %v1617_v36 }
 0x18f   : > { %v1512_v38 = vsel %vm1510_vm6, %v1511_v19, %v1509_v27  ;;  %v1627_v1 = vsel %vm1626_vm9, 1, %v3507_v31  ;;  %v1640_v4 = vshll.u32 %v1637_v51, 16  ;;  %vm1402_vm7 = vcmp.eq.s32.totalorder %v1397_v63, 2 }
 0x190   : > { %v1513_v48 = vclz %v1512_v38  ;;  %v1387_v35 = vadd.f32 1.0, %v1386_v34  ;;  %v1394_v32 = vadd.f32 1.0, %v1393_v15  ;;  %v1629_v60 = vadd.s32 %v1627_v1, %v1625_v50 }
 0x191   : > { %v1621_v7 = vshrl.u32 %v1616_v13, 16  ;;  %v1639_v20 = vmul.u32 %v1635_v54, %v1611_v12  ;;  %vm1644_vm4 = vc.u32 %v1636_v40, %v1640_v4  ;;  %vm1399_vm14 = vcmp.eq.s32.totalorder %v1397_v63, 0 }
 0x192   : > { %v2037_v21 = vadd.s32 4294967294, %v1513_v48  ;;  %v1395_v62 = vmul.f32 %v1394_v32, %v1379_v14  ;;  %v1403_v46 = vxor.u32 2147483648, %v1387_v35  ;;  %v1630_v25 = vadd.s32 %v1629_v60, %v1619_v28 }
 0x193   : > { %v1645_v44 = vsel %vm1644_vm4, 1, %v3507_v31  ;;  %v1642_v3 = vshll.u32 %v1638_v59, 16  ;;  %v1646_v39 = vadd.s32 %v1640_v4, %v1636_v40  ;;  %v1598_v54 = vsel %vm1596_vm13, %v3269_v22, 2102212464 }
 0x194   : > { %vm2038_vm12 = vcmp.lt.s32.totalorder %v2037_v21, 0  ;;  %v1400_v45 = vxor.u32 2147483648, %v1395_v62  ;;  %v1404_v26 = vsel %vm1402_vm7, %v1403_v46, %v1395_v62  ;;  %v1631_v58 = vadd.s32 %v1630_v25, %v1621_v7 }
 0x195   : > { %v1516_v10 = vsel %vm2038_vm12, 0, %v2037_v21  ;;  %v1647_v14 = vadd.s32 %v1645_v44, %v1639_v20  ;;  %vm1648_vm2 = vc.u32 %v1646_v39, %v1642_v3  ;;  %v1650_v9 = vadd.s32 %v1646_v39, %v1642_v3 }
 0x196   : > { %v1517_v0 = vsub.s32 32, %v1516_v10  ;;  %v1521_v2 = vsub.s32 4294967266, %v1516_v10  ;;  %v1401_v11 = vsel %vm1399_vm14, %v1387_v35, %v1400_v45  ;;  %v1518_v13 = vshll.u32 %v1509_v27, %v1516_v10 }
 0x197   : > { %v1405_v61 = vsel %vm1398_vm10, %v1401_v11, %v1404_v26  ;;  %v1577_v63 = vshrl.u32 %v3509_v29, %v3532_v37  ;;  %v1649_v27 = vsel %vm1648_vm2, 1, %v3507_v31  ;;  %v1655_v16 = vadd.s32 %v1650_v9, %v1631_v58 }
 0x198   : > { %v1519_v55 = vshrl.u32 %v3239_v24, %v1517_v0  ;;  %v1522_v12 = vadd.s32 127, %v1521_v2  ;;  %v1406_v23 = vsel %vm1396_vm11, nan, %v1405_v61  ;;  %v1641_v24 = vshrl.u32 %v1637_v51, 16 }
 0x199   : > { %2047 = vmatmul.msk.f32.gmra.mxu1 %vm1727_vm1, %v1406_v23  ;;  %v1651_v36 = vadd.s32 %v1649_v27, %v1647_v14  ;;  %vm1656_vm3 = vc.u32 %v1631_v58, %v1650_v9  ;;  %v1597_v22 = vsel %vm1593_vm0, %v1577_v63, %v3265_v5  ;;  %v1599_v49 = vsel %vm1595_vm15, %v3267_v18, %v1598_v54 }
 0x19a   : > { %v1520_v42 = vor.u32 %v1519_v55, %v1518_v13  ;;  %v1523_v17 = vshll.u32 %v1522_v12, 23  ;;  %v1643_v41 = vshrl.u32 %v1638_v59, 16  ;;  %v1600_v29 = vsel %vm1594_vm8, %v1597_v22, %v1599_v49 }
 0x19b   : > { %v1652_v53 = vadd.s32 %v1651_v36, %v1641_v24  ;;  %v1654_v15 = vmul.u32 %v3307_v33, %v1600_v29  ;;  %vm1409_vm13 = vcmp.lt.s32.totalorder %v3540_v56, 0  ;;  %vm3345_vm0 = vcmp.le.f32.partialorder %v1407_v8, 0.7853982  ;;  %v414_v24 = vpop.f32.mrf.mxu0  ;;  %v1812_v36 = vld [vmem:[%s3442_s6 + $0x18] sm:$0xff] }
 0x19c   : > { %v1524_v47 = vor.u32 4788187, %v1523_v17  ;;  %v1527_v30 = vcvt.s32.f32 %v1520_v42  ;;  %v1531_v48 = vsub.s32 4, %v3313_v52  ;;  %vm1550_vm9 = vweird.f32 %v3540_v56  ;;  %1854 = vmatpush.msra.mxu2 %v1812_v36 }
 0x19d   : > { %v1653_v31 = vadd.s32 %v1652_v53, %v1643_v41  ;;  %v1809_v41 = vld [vmem:[%s3442_s6] sm:$0xff]  ;;  %vm1563_vm10 = vcmp.lt.s32.totalorder %v3546_v43, 0  ;;  %vm3376_vm7 = vcmp.le.f32.partialorder %v1561_v57, 0.7853982  ;;  %vm1817_vm12 = vcmask 261120  }
 0x19e   : > { %v1525_v19 = vand.u32 2147483647, %v1524_v47  ;;  %v1532_v40 = vsel %vm1409_vm13, %v1531_v48, %v3313_v52  ;;  %v3390_v57 = vld [vmem:[%s3441_s5] ss:$0 sm:$0xff] }
 0x19f   : > { %v1657_v51 = vadd.s32 1, %v1653_v31  ;;  %v1534_v46 = vsel %vm3345_vm0, 0, %v1532_v40 }
 0x1a0   : > { %v1528_v37 = vmul.f32 %v1527_v30, %v1525_v19  ;;  %v1551_v44 = vand.u32 3, %v1534_v46 }
 0x1a1   : > { %v1658_v5 = vsel %vm1656_vm3, %v1657_v51, %v1653_v31  ;;  %vm1704_vm3 = vweird.f32 %v3546_v43 }
 0x1a2   : > { %v1529_v34 = vxor.u32 2147483648, %v1528_v37  ;;  %v1659_v50 = vadd.s32 %v1658_v5, %v1654_v15  ;;  %vm1556_vm8 = vcmp.eq.s32.totalorder %v1551_v44, 2  ;;  %vm1553_vm6 = vcmp.eq.s32.totalorder %v1551_v44, 0  ;;  %v2095_v15 = vld [vmem:[%s3439_s3] ss:$0 sm:$0xff] }
 0x1a3   : > { %vm1552_vm11 = vcmp.lt.s32.totalorder %v1551_v44, 2  ;;  %v417_v30 = vpop.f32.mrf.mxu0  ;;  %v415_v48 = vadd.f32 %v2095_v15, %v414_v24 }
 0x1a4   : > { %v1530_v38 = vsel %vm1409_vm13, %v1529_v34, %v1528_v37  ;;  %v1660_v35 = vadd.s32 536870912, %v1659_v50 }
 0x1a5   : > { %v1533_v6 = vsel %vm3345_vm0, %v3540_v56, %v1530_v38  ;;  %v1811_v56 = vld [vmem:[%s3442_s6 + $0x10] sm:$0xff] }
 0x1a6   : > { %v1535_v28 = vmul.f32 %v1533_v6, %v1533_v6  ;;  %v3353_v1 = vshrl.u32 %v1660_v35, 30  ;;  %1855 = vmatpush.msra.mxu2 %v1811_v56 }
 0x1a8   : > { %v1536_v33 = vmul.f32 -0.001358992, %v1535_v28  ;;  %v1543_v32 = vmul.f32 -0.00019511016, %v1535_v28  ;;  %v1662_v60 = vshll.u32 %v3353_v1, 30  ;;  %v1685_v51 = vsub.s32 4, %v3353_v1 }
 0x1aa   : > { %v1537_v8 = vadd.f32 0.041655596, %v1536_v33  ;;  %v1544_v21 = vadd.f32 0.008332121, %v1543_v32  ;;  %v1663_v62 = vsub.s32 %v1659_v50, %v1662_v60  ;;  %v1686_v38 = vsel %vm1563_vm10, %v1685_v51, %v3353_v1 }
 0x1ab   : > { %v1688_v40 = vsel %vm3376_vm7, 0, %v1686_v38  ;;  %v420_v60 = vmax.f32 %v415_v48, 0.0  ;;  %v2097_v38 = vld [vmem:[%s3443_s7] ss:$0 sm:$0xff] }
 0x1ac   : > { %v1538_v59 = vmul.f32 %v1537_v8, %v1535_v28  ;;  %v1545_v4 = vmul.f32 %v1544_v21, %v1535_v28  ;;  %vm1664_vm15 = vcmp.lt.s32.totalorder %v1663_v62, 0  ;;  %v1665_v20 = vsub.s32 0, %v1663_v62 }
 0x1ad   : > { %v1705_v1 = vand.u32 3, %v1688_v40 }
 0x1ae   : > { %v1539_v7 = vadd.f32 -0.4999988, %v1538_v59  ;;  %v1546_v25 = vadd.f32 -0.16666654, %v1545_v4  ;;  %v1666_v10 = vsel %vm1664_vm15, %v1665_v20, %v1663_v62 }
 0x1af   : > { %v1667_v0 = vclz %v1666_v10  ;;  %vm1710_vm4 = vcmp.eq.s32.totalorder %v1705_v1, 2  ;;  %vm1707_vm14 = vcmp.eq.s32.totalorder %v1705_v1, 0  ;;  %vm1706_vm2 = vcmp.lt.s32.totalorder %v1705_v1, 2 }
 0x1b0   : > { %v1540_v45 = vmul.f32 %v1539_v7, %v1535_v28  ;;  %v1547_v26 = vmul.f32 %v1546_v25, %v1535_v28  ;;  %v1769_v28 = vpop.f32.mrf.mxu0 }
 0x1b1   : > { %v2040_v3 = vadd.s32 4294967294, %v1667_v0  ;;  %v1770_v32 = vadd.f32 %v3390_v57, %v1769_v28 }
 0x1b2   : > { %v1541_v52 = vadd.f32 1.0, %v1540_v45  ;;  %v1548_v2 = vadd.f32 1.0, %v1547_v26 }
 0x1b3   : > { %vm2041_vm5 = vcmp.lt.s32.totalorder %v2040_v3, 0  ;;  %v1793_v59 = vmax.f32 %v1770_v32, 0.0 }
 0x1b4   : > { %v1549_v11 = vmul.f32 %v1548_v2, %v1533_v6  ;;  %v1557_v58 = vxor.u32 2147483648, %v1541_v52  ;;  %v1670_v61 = vsel %vm2041_vm5, 0, %v2040_v3 }
 0x1b5   : > { %v1671_v13 = vsub.s32 32, %v1670_v61  ;;  %v1675_v55 = vsub.s32 4294967266, %v1670_v61  ;;  %v1672_v54 = vshll.u32 %v1663_v62, %v1670_v61  ;;  %v1801_v46 = vmul.f32 %v1793_v59, %v420_v60  ;;  %v1778_v61 = vpop.f32.mrf.mxu1 }
 0x1b6   : > { %v1554_v39 = vxor.u32 2147483648, %v1549_v11  ;;  %v1558_v14 = vsel %vm1556_vm8, %v1557_v58, %v1549_v11 }
 0x1b7   : > { %v1673_v9 = vshrl.u32 %v1655_v16, %v1671_v13  ;;  %v1676_v42 = vadd.s32 127, %v1675_v55  ;;  %v1810_v16 = vld [vmem:[%s3442_s6 + $0x8] sm:$0xff]  ;;  %v1779_v55 = vadd.f32 %v3390_v57, %v1778_v61 }
 0x1b8   : > { %v1555_v12 = vsel %vm1553_vm6, %v1541_v52, %v1554_v39  ;;  %1856 = vmatpush.msra.mxu2 %v1810_v16  ;;  %v1772_v20 = vpop.f32.mrf.mxu0 }
 0x1b9   : > { %v1559_v23 = vsel %vm1552_vm11, %v1555_v12, %v1558_v14  ;;  %v1674_v63 = vor.u32 %v1673_v9, %v1672_v54  ;;  %v1677_v27 = vshll.u32 %v1676_v42, 23  ;;  %v1773_v10 = vadd.f32 %v3390_v57, %v1772_v20 }
 0x1ba   : > { %v1560_v17 = vsel %vm1550_vm9, nan, %v1559_v23  ;;  %1857 = vmatpush.msra.mxu2 %v1809_v41  ;;  %v1796_v23 = vmax.f32 %v1779_v55, 0.0 }
 0x1bb   : > { %2048 = vmatmul.msk.f32.gmra.mxu1 %vm1727_vm1, %v1560_v17  ;;  %v1678_v47 = vor.u32 4788187, %v1677_v27  ;;  %v1681_v49 = vcvt.s32.f32 %v1674_v63  ;;  %2050 = vmatmul.msk.f32.vlgmr.msra.gmra.mxu2 %vm1817_vm12, %v1801_v46  ;;  %v1794_v52 = vmax.f32 %v1773_v10, 0.0 }
 0x1bc   : > { %v1804_v54 = vmul.f32 %v1796_v23, %v420_v60 }
 0x1bd   : > { %v1679_v22 = vand.u32 2147483647, %v1678_v47  ;;  %v1802_v3 = vmul.f32 %v1794_v52, %v420_v60 }
 0x1bf   : > { %v1682_v53 = vmul.f32 %v1681_v49, %v1679_v22 }
 0x1c1   : > { %v1683_v19 = vxor.u32 2147483648, %v1682_v53 }
 0x1c3   : > { %v1684_v31 = vsel %vm1563_vm10, %v1683_v19, %v1682_v53  ;;  %2051 = vmatmul.msk.f32.gmra.mxu2 %vm1817_vm12, %v1802_v3 }
 0x1c4   : > { %v1687_v37 = vsel %vm3376_vm7, %v3546_v43, %v1684_v31  ;;  %v418_v43 = vadd.f32 %v2095_v15, %v417_v30 }
 0x1c5   : > { %v1689_v34 = vmul.f32 %v1687_v37, %v1687_v37 }
 0x1c6   : > { %v421_v17 = vmax.f32 %v418_v43, 0.0 }
 0x1c7   : > { %v1690_v5 = vmul.f32 -0.001358992, %v1689_v34  ;;  %v1697_v18 = vmul.f32 -0.00019511016, %v1689_v34 }
 0x1c9   : > { %v1691_v50 = vadd.f32 0.041655596, %v1690_v5  ;;  %v1698_v6 = vadd.f32 0.008332121, %v1697_v18 }
 0x1cb   : > { %v1692_v35 = vmul.f32 %v1691_v50, %v1689_v34  ;;  %v1699_v33 = vmul.f32 %v1698_v6, %v1689_v34 }
 0x1cd   : > { %v1693_v8 = vadd.f32 -0.4999988, %v1692_v35  ;;  %v1700_v21 = vadd.f32 -0.16666654, %v1699_v33 }
 0x1cf   : > { %v1694_v4 = vmul.f32 %v1693_v8, %v1689_v34  ;;  %v1701_v62 = vmul.f32 %v1700_v21, %v1689_v34 }
 0x1d1   : > { %v1695_v7 = vadd.f32 1.0, %v1694_v4  ;;  %v1702_v25 = vadd.f32 1.0, %v1701_v62 }
 0x1d3   : > { %v1703_v45 = vmul.f32 %v1702_v25, %v1687_v37  ;;  %v1711_v26 = vxor.u32 2147483648, %v1695_v7  ;;  %v1896_v25 = vpop.permute.xlu2 %1895 }
 0x1d4   : > { %v1898_v20 = vperm.slane %v1896_v25, 0 }
 0x1d5   : > { %v1708_v44 = vxor.u32 2147483648, %v1703_v45  ;;  %v1712_v0 = vsel %vm1710_vm4, %v1711_v26, %v1703_v45  ;;  %v1775_v39 = vpop.f32.mrf.mxu0 }
 0x1d6   : > { %v1776_v14 = vadd.f32 %v3390_v57, %v1775_v39 }
 0x1d7   : > { %v1709_v2 = vsel %vm1707_vm14, %v1695_v7, %v1708_v44  ;;  %v1891_v7 = vld [vmem:[%s3444_s8] sm:$0x1] }
 0x1d8   : > { %v1713_v11 = vsel %vm1706_vm2, %v1709_v2, %v1712_v0  ;;  %v1795_v13 = vmax.f32 %v1776_v14, 0.0 }
 0x1d9   : > { %v1714_v58 = vsel %vm1704_vm3, nan, %v1713_v11 }
 0x1da   : > { %2049 = vmatmul.msk.f32.gmra.mxu1 %vm1727_vm1, %v1714_v58  ;;  %v1803_v12 = vmul.f32 %v1795_v13, %v420_v60  ;;  %vm1946_vm1 = vcmask 516096  }
 0x1dc   : > { %2052 = vmatmul.msk.f32.gmra.mxu2 %vm1817_vm12, %v1803_v12 }
 0x1e4   : > { %2053 = vmatmul.msk.f32.gmra.mxu2 %vm1817_vm12, %v1804_v54 }
 0x1f7   : > { %v1781_v9 = vpop.f32.mrf.mxu1 }
 0x1f8   : > { %v1782_v42 = vadd.f32 %v3390_v57, %v1781_v9 }
 0x1fa   : > { %v1797_v63 = vmax.f32 %v1782_v42, 0.0 }
 0x1fc   : > { %v1805_v27 = vmul.f32 %v1797_v63, %v421_v17 }
 0x1fe   : > { %2054 = vmatmul.msk.f32.gmra.mxu2 %vm1817_vm12, %v1805_v27 }
 0x216   : > { %v1784_v24 = vpop.f32.mrf.mxu1 }
 0x217   : > { %v1785_v36 = vadd.f32 %v3390_v57, %v1784_v24 }
 0x219   : > { %v1798_v47 = vmax.f32 %v1785_v36, 0.0 }
 0x21b   : > { %v1806_v56 = vmul.f32 %v1798_v47, %v421_v17 }
 0x21d   : > { %2055 = vmatmul.msk.f32.gmra.mxu2 %vm1817_vm12, %v1806_v56 }
 0x238   : > { %v1787_v16 = vpop.f32.mrf.mxu1 }
 0x239   : > { %v1788_v22 = vadd.f32 %v3390_v57, %v1787_v16 }
 0x23b   : > { %v1799_v49 = vmax.f32 %v1788_v22, 0.0 }
 0x23d   : > { %v1807_v41 = vmul.f32 %v1799_v49, %v421_v17 }
 0x23e   : > { %v1859_v31 = vpop.f32.mrf.mxu2 }
 0x23f   : > { %2056 = vmatmul.msk.f32.gmra.mxu2 %vm1817_vm12, %v1807_v41  ;;  %v1860_v62 = vadd.f32 %v2097_v38, %v1859_v31 }
 0x241   : > { %v1883_v1 = vmax.f32 %v1860_v62, 0.0 }
 0x246   : > { %v1862_v37 = vpop.f32.mrf.mxu2 }
 0x247   : > { %v1863_v59 = vadd.f32 %v2097_v38, %v1862_v37 }
 0x249   : > { %v1884_v46 = vmax.f32 %v1863_v59, 0.0 }
 0x257   : > { %v1790_v53 = vpop.f32.mrf.mxu1 }
 0x258   : > { %v1791_v19 = vadd.f32 %v3390_v57, %v1790_v53 }
 0x25a   : > { %v1800_v30 = vmax.f32 %v1791_v19, 0.0 }
 0x25c   : > { %v1808_v29 = vmul.f32 %v1800_v30, %v421_v17 }
 0x25e   : > { %2057 = vmatmul.msk.f32.gmra.mxu2 %vm1817_vm12, %v1808_v29 }
 0x25f   : > { %v1865_v51 = vpop.f32.mrf.mxu2 }
 0x260   : > { %v1866_v21 = vadd.f32 %v2097_v38, %v1865_v51 }
 0x262   : > { %v1885_v4 = vmax.f32 %v1866_v21, 0.0 }
 0x267   : > { %v1868_v34 = vpop.f32.mrf.mxu2 }
 0x268   : > { %v1869_v40 = vadd.f32 %v2097_v38, %v1868_v34 }
 0x26a   : > { %v1886_v60 = vmax.f32 %v1869_v40, 0.0 }
 0x281   : > { %v1871_v15 = vpop.f32.mrf.mxu2 }
 0x282   : > { %v1872_v33 = vadd.f32 %v2097_v38, %v1871_v15 }
 0x284   : > { %v1887_v8 = vmax.f32 %v1872_v33, 0.0 }
 0x2a0   : > { %v1874_v5 = vpop.f32.mrf.mxu2 }
 0x2a1   : > { %v1875_v57 = vadd.f32 %v2097_v38, %v1874_v5 }
 0x2a3   : > { %v1888_v32 = vmax.f32 %v1875_v57, 0.0 }
 0x2c2   : > { %v1877_v18 = vpop.f32.mrf.mxu2 }
 0x2c3   : > { %v1878_v48 = vadd.f32 %v2097_v38, %v1877_v18 }
 0x2c5   : > { %v1889_v35 = vmax.f32 %v1878_v48, 0.0 }
 0x2e1   : > { %v1880_v50 = vpop.f32.mrf.mxu2 }
 0x2e2   : > { %v1881_v6 = vadd.f32 %v2097_v38, %v1880_v50 }
 0x2e4   : > { %v1890_v28 = vmax.f32 %v1881_v6, 0.0 }
 0x2e6   : > { %2058 = vmatpush.xpose.msk.msra.mxu3 %vm1817_vm12, %v1890_v28 }
 0x2ea   : > { %2059 = vmatpush.xpose.msk.msra.mxu3 %vm1817_vm12, %v1889_v35 }
 0x2ee   : > { %2060 = vmatpush.xpose.msk.msra.mxu3 %vm1817_vm12, %v1888_v32 }
 0x2f2   : > { %2061 = vmatpush.xpose.msk.msra.mxu3 %vm1817_vm12, %v1887_v8 }
 0x2f6   : > { %2062 = vmatpush.xpose.msk.msra.mxu3 %vm1817_vm12, %v1886_v60 }
 0x2fa   : > { %2063 = vmatpush.xpose.msk.msra.mxu3 %vm1817_vm12, %v1885_v4 }
 0x2fe   : > { %2064 = vmatpush.xpose.msk.msra.mxu3 %vm1817_vm12, %v1884_v46 }
 0x302   : > { %2065 = vmatpush.xpose.msk.msra.mxu3 %vm1817_vm12, %v1883_v1 }
 0x305   : > { %2066 = vmatmul.msk.f32.vlgmr.msra.gmra.mxu3 %vm1817_vm12, %v1891_v7 }
 0x388   : > { %v1943_v45 = vpop.f32.mrf.mxu3 }
 0x389   : > { %v1944_v26 = vadd.f32 %v1943_v45, %v1898_v20 }
 0x38b   : > { %1947 = vst.msk [vmem:[%s381_s27] sm:$0x1] %vm1946_vm1, %v1944_v26 }
 0x38c PF: > { %s22_s15 = sadd.s32 1, %s2104_s15  }
 0x38d   : > { %p19_p6 = scmp.ge.s32.totalorder %s22_s15, 4  }
 0x38f   :  { %21 = sbr.rel (!%p19_p6) target bundleno = 3 (0x3), region = 93 }

</bundles_post_ra>
